<compile_context>
chip_gen: v7x
topology: tpu7x:2x2x1
jax: 0.10.0
libtpu: 0.0.40
codegen_flags: <defaults>
</compile_context>

<pallas_src>
import jax
import jax.numpy as jnp
from jax.experimental import pallas as pl
from jax.experimental.pallas import tpu as pltpu

IN_FEATURES = 10
OUT_FEATURES = 5
TB = 512  # batch tile along the lane axis; 512+ rows amortize per-step overhead


def _linear_relu_sum_kernel(xt_ref, w_ref, b_ref, o_ref):
    # xt_ref: (IN, TB) f32 in VMEM (lane-dense batch tile)
    # w_ref:  (OUT, IN) f32 in SMEM (scalar reads)
    # b_ref:  (OUT,)    f32 in SMEM (scalar reads)
    # o_ref:  (1, TB)   f32 in VMEM (lane-dense output tile)
    x = xt_ref[...]                                        # (IN, TB)
    rows = [x[k:k + 1, :] for k in range(IN_FEATURES)]     # 10 x (1, TB) sublane rows

    acc = jnp.zeros((1, TB), dtype=jnp.float32)
    for j in range(OUT_FEATURES):                          # unrolled at trace time
        yj = rows[0] * w_ref[j, 0] + b_ref[j]
        for k in range(1, IN_FEATURES):
            yj = yj + rows[k] * w_ref[j, k]                # pure-VPU multiply-add
        acc = acc + jnp.maximum(yj, 0.0)                   # ReLU + sum over dim=1 (VPU)
    o_ref[...] = acc


@jax.jit
def simple_model_forward(x, weight, bias):
    """x: (B, IN) f32, weight: (OUT, IN) f32, bias: (OUT,) f32 -> (B,) f32."""
    B = x.shape[0]
    n_tiles = pl.cdiv(B, TB)
    b_pad = n_tiles * TB

    # Lane-dense layout: batch along lanes; zero-pad to a whole number of tiles.
    xt = jnp.pad(x.T, ((0, 0), (0, b_pad - B)))            # (IN, B_pad)

    cost = pl.CostEstimate(
        flops=2 * b_pad * IN_FEATURES * OUT_FEATURES + 2 * b_pad * OUT_FEATURES,
        transcendentals=0,
        bytes_accessed=(b_pad * IN_FEATURES * 4 + b_pad * 4
                        + OUT_FEATURES * IN_FEATURES * 4 + OUT_FEATURES * 4),
    )

    out = pl.pallas_call(
        _linear_relu_sum_kernel,
        out_shape=jax.ShapeDtypeStruct((1, b_pad), jnp.float32),
        grid=(n_tiles,),
        in_specs=[
            pl.BlockSpec((IN_FEATURES, TB), lambda i: (0, i)),      # x tile (VMEM)
            pl.BlockSpec(memory_space=pltpu.MemorySpace.SMEM),      # weight (5,10)
            pl.BlockSpec(memory_space=pltpu.MemorySpace.SMEM),      # bias   (5,)
        ],
        out_specs=pl.BlockSpec((1, TB), lambda i: (0, i)),
        compiler_params=pltpu.CompilerParams(
            dimension_semantics=("parallel",),                      # shard tiles across TCs (v7x)
        ),
        cost_estimate=cost,
    )(xt, weight, bias)

    return out[0, :B]                                      # (B,), matches torch.sum(z, dim=1)


if __name__ == "__main__":
    key = jax.random.PRNGKey(0)
    kx, kw, kb = jax.random.split(key, 3)

    B = 1000  # exercises 2 grid tiles plus the padding/slice path; still tiny
    x = jax.random.normal(kx, (B, IN_FEATURES), dtype=jnp.float32)
    # Deterministic init mimicking nn.Linear's uniform(-1/sqrt(IN), 1/sqrt(IN))
    bound = 1.0 / (IN_FEATURES ** 0.5)
    weight = jax.random.uniform(
        kw, (OUT_FEATURES, IN_FEATURES), minval=-bound, maxval=bound,
        dtype=jnp.float32)
    bias = jax.random.uniform(
        kb, (OUT_FEATURES,), minval=-bound, maxval=bound, dtype=jnp.float32)

    out = simple_model_forward(x, weight, bias)
    jax.block_until_ready(out)

    # Reference check in plain JAX
    ref = jnp.sum(jnp.maximum(x @ weight.T + bias, 0.0), axis=1)
    assert out.shape == (B,)
    assert jnp.allclose(out, ref, atol=1e-5, rtol=1e-5)

    print("KERNEL_OK")
</pallas_src>

<mosaic_0001>
module attributes {stable_mosaic.version = 11 : i64} {
  func.func @_linear_relu_sum_kernel(%arg0: i32, %arg1: memref<10x512xf32, #tpu.memory_space<vmem>>, %arg2: memref<5x10xf32, #tpu.memory_space<smem>>, %arg3: memref<5xf32, #tpu.memory_space<smem>>, %arg4: memref<1x512xf32, #tpu.memory_space<vmem>>) attributes {dimension_semantics = [#tpu.dimension_semantics<parallel>], iteration_bounds = array<i64: 2>, scalar_prefetch = 0 : i64, scratch_operands = 0 : i64, tpu.core_type = #tpu.core_type<tc>, window_params = [{transform_indices = @transform_0, window_bounds = array<i64: 10, 512>}, {transform_indices = @transform_1, window_bounds = array<i64: 5, 10>}, {transform_indices = @transform_2, window_bounds = array<i64: 5>}, {transform_indices = @transform_3, window_bounds = array<i64: 1, 512>}]} {
    %c0 = arith.constant 0 : index
    %c0_0 = arith.constant 0 : index
    %0 = vector.load %arg1[%c0, %c0_0] : memref<10x512xf32, #tpu.memory_space<vmem>>, vector<10x512xf32>
    %1 = vector.extract_strided_slice %0 {offsets = [0, 0], sizes = [1, 512], strides = [1, 1]} : vector<10x512xf32> to vector<1x512xf32>
    %2 = vector.extract_strided_slice %0 {offsets = [1, 0], sizes = [1, 512], strides = [1, 1]} : vector<10x512xf32> to vector<1x512xf32>
    %3 = vector.extract_strided_slice %0 {offsets = [2, 0], sizes = [1, 512], strides = [1, 1]} : vector<10x512xf32> to vector<1x512xf32>
    %4 = vector.extract_strided_slice %0 {offsets = [3, 0], sizes = [1, 512], strides = [1, 1]} : vector<10x512xf32> to vector<1x512xf32>
    %5 = vector.extract_strided_slice %0 {offsets = [4, 0], sizes = [1, 512], strides = [1, 1]} : vector<10x512xf32> to vector<1x512xf32>
    %6 = vector.extract_strided_slice %0 {offsets = [5, 0], sizes = [1, 512], strides = [1, 1]} : vector<10x512xf32> to vector<1x512xf32>
    %7 = vector.extract_strided_slice %0 {offsets = [6, 0], sizes = [1, 512], strides = [1, 1]} : vector<10x512xf32> to vector<1x512xf32>
    %8 = vector.extract_strided_slice %0 {offsets = [7, 0], sizes = [1, 512], strides = [1, 1]} : vector<10x512xf32> to vector<1x512xf32>
    %9 = vector.extract_strided_slice %0 {offsets = [8, 0], sizes = [1, 512], strides = [1, 1]} : vector<10x512xf32> to vector<1x512xf32>
    %10 = vector.extract_strided_slice %0 {offsets = [9, 0], sizes = [1, 512], strides = [1, 1]} : vector<10x512xf32> to vector<1x512xf32>
    %cst = arith.constant 0.000000e+00 : f32
    %11 = vector.broadcast %cst : f32 to vector<1x512xf32>
    %c0_1 = arith.constant 0 : index
    %c0_2 = arith.constant 0 : index
    %12 = memref.load %arg2[%c0_1, %c0_2] : memref<5x10xf32, #tpu.memory_space<smem>>
    %13 = vector.broadcast %12 : f32 to vector<1x512xf32>
    %14 = arith.mulf %1, %13 : vector<1x512xf32>
    %c0_3 = arith.constant 0 : index
    %15 = memref.load %arg3[%c0_3] : memref<5xf32, #tpu.memory_space<smem>>
    %16 = vector.broadcast %15 : f32 to vector<1x512xf32>
    %17 = arith.addf %14, %16 : vector<1x512xf32>
    %c0_4 = arith.constant 0 : index
    %c1 = arith.constant 1 : index
    %18 = memref.load %arg2[%c0_4, %c1] : memref<5x10xf32, #tpu.memory_space<smem>>
    %19 = vector.broadcast %18 : f32 to vector<1x512xf32>
    %20 = arith.mulf %2, %19 : vector<1x512xf32>
    %21 = arith.addf %17, %20 : vector<1x512xf32>
    %c0_5 = arith.constant 0 : index
    %c2 = arith.constant 2 : index
    %22 = memref.load %arg2[%c0_5, %c2] : memref<5x10xf32, #tpu.memory_space<smem>>
    %23 = vector.broadcast %22 : f32 to vector<1x512xf32>
    %24 = arith.mulf %3, %23 : vector<1x512xf32>
    %25 = arith.addf %21, %24 : vector<1x512xf32>
    %c0_6 = arith.constant 0 : index
    %c3 = arith.constant 3 : index
    %26 = memref.load %arg2[%c0_6, %c3] : memref<5x10xf32, #tpu.memory_space<smem>>
    %27 = vector.broadcast %26 : f32 to vector<1x512xf32>
    %28 = arith.mulf %4, %27 : vector<1x512xf32>
    %29 = arith.addf %25, %28 : vector<1x512xf32>
    %c0_7 = arith.constant 0 : index
    %c4 = arith.constant 4 : index
    %30 = memref.load %arg2[%c0_7, %c4] : memref<5x10xf32, #tpu.memory_space<smem>>
    %31 = vector.broadcast %30 : f32 to vector<1x512xf32>
    %32 = arith.mulf %5, %31 : vector<1x512xf32>
    %33 = arith.addf %29, %32 : vector<1x512xf32>
    %c0_8 = arith.constant 0 : index
    %c5 = arith.constant 5 : index
    %34 = memref.load %arg2[%c0_8, %c5] : memref<5x10xf32, #tpu.memory_space<smem>>
    %35 = vector.broadcast %34 : f32 to vector<1x512xf32>
    %36 = arith.mulf %6, %35 : vector<1x512xf32>
    %37 = arith.addf %33, %36 : vector<1x512xf32>
    %c0_9 = arith.constant 0 : index
    %c6 = arith.constant 6 : index
    %38 = memref.load %arg2[%c0_9, %c6] : memref<5x10xf32, #tpu.memory_space<smem>>
    %39 = vector.broadcast %38 : f32 to vector<1x512xf32>
    %40 = arith.mulf %7, %39 : vector<1x512xf32>
    %41 = arith.addf %37, %40 : vector<1x512xf32>
    %c0_10 = arith.constant 0 : index
    %c7 = arith.constant 7 : index
    %42 = memref.load %arg2[%c0_10, %c7] : memref<5x10xf32, #tpu.memory_space<smem>>
    %43 = vector.broadcast %42 : f32 to vector<1x512xf32>
    %44 = arith.mulf %8, %43 : vector<1x512xf32>
    %45 = arith.addf %41, %44 : vector<1x512xf32>
    %c0_11 = arith.constant 0 : index
    %c8 = arith.constant 8 : index
    %46 = memref.load %arg2[%c0_11, %c8] : memref<5x10xf32, #tpu.memory_space<smem>>
    %47 = vector.broadcast %46 : f32 to vector<1x512xf32>
    %48 = arith.mulf %9, %47 : vector<1x512xf32>
    %49 = arith.addf %45, %48 : vector<1x512xf32>
    %c0_12 = arith.constant 0 : index
    %c9 = arith.constant 9 : index
    %50 = memref.load %arg2[%c0_12, %c9] : memref<5x10xf32, #tpu.memory_space<smem>>
    %51 = vector.broadcast %50 : f32 to vector<1x512xf32>
    %52 = arith.mulf %10, %51 : vector<1x512xf32>
    %53 = arith.addf %49, %52 : vector<1x512xf32>
    %cst_13 = arith.constant 0.000000e+00 : f32
    %54 = vector.broadcast %cst_13 : f32 to vector<1x512xf32>
    %55 = arith.maximumf %53, %54 : vector<1x512xf32>
    %56 = arith.addf %11, %55 : vector<1x512xf32>
    %c1_14 = arith.constant 1 : index
    %c0_15 = arith.constant 0 : index
    %57 = memref.load %arg2[%c1_14, %c0_15] : memref<5x10xf32, #tpu.memory_space<smem>>
    %58 = vector.broadcast %57 : f32 to vector<1x512xf32>
    %59 = arith.mulf %1, %58 : vector<1x512xf32>
    %c1_16 = arith.constant 1 : index
    %60 = memref.load %arg3[%c1_16] : memref<5xf32, #tpu.memory_space<smem>>
    %61 = vector.broadcast %60 : f32 to vector<1x512xf32>
    %62 = arith.addf %59, %61 : vector<1x512xf32>
    %c1_17 = arith.constant 1 : index
    %c1_18 = arith.constant 1 : index
    %63 = memref.load %arg2[%c1_17, %c1_18] : memref<5x10xf32, #tpu.memory_space<smem>>
    %64 = vector.broadcast %63 : f32 to vector<1x512xf32>
    %65 = arith.mulf %2, %64 : vector<1x512xf32>
    %66 = arith.addf %62, %65 : vector<1x512xf32>
    %c1_19 = arith.constant 1 : index
    %c2_20 = arith.constant 2 : index
    %67 = memref.load %arg2[%c1_19, %c2_20] : memref<5x10xf32, #tpu.memory_space<smem>>
    %68 = vector.broadcast %67 : f32 to vector<1x512xf32>
    %69 = arith.mulf %3, %68 : vector<1x512xf32>
    %70 = arith.addf %66, %69 : vector<1x512xf32>
    %c1_21 = arith.constant 1 : index
    %c3_22 = arith.constant 3 : index
    %71 = memref.load %arg2[%c1_21, %c3_22] : memref<5x10xf32, #tpu.memory_space<smem>>
    %72 = vector.broadcast %71 : f32 to vector<1x512xf32>
    %73 = arith.mulf %4, %72 : vector<1x512xf32>
    %74 = arith.addf %70, %73 : vector<1x512xf32>
    %c1_23 = arith.constant 1 : index
    %c4_24 = arith.constant 4 : index
    %75 = memref.load %arg2[%c1_23, %c4_24] : memref<5x10xf32, #tpu.memory_space<smem>>
    %76 = vector.broadcast %75 : f32 to vector<1x512xf32>
    %77 = arith.mulf %5, %76 : vector<1x512xf32>
    %78 = arith.addf %74, %77 : vector<1x512xf32>
    %c1_25 = arith.constant 1 : index
    %c5_26 = arith.constant 5 : index
    %79 = memref.load %arg2[%c1_25, %c5_26] : memref<5x10xf32, #tpu.memory_space<smem>>
    %80 = vector.broadcast %79 : f32 to vector<1x512xf32>
    %81 = arith.mulf %6, %80 : vector<1x512xf32>
    %82 = arith.addf %78, %81 : vector<1x512xf32>
    %c1_27 = arith.constant 1 : index
    %c6_28 = arith.constant 6 : index
    %83 = memref.load %arg2[%c1_27, %c6_28] : memref<5x10xf32, #tpu.memory_space<smem>>
    %84 = vector.broadcast %83 : f32 to vector<1x512xf32>
    %85 = arith.mulf %7, %84 : vector<1x512xf32>
    %86 = arith.addf %82, %85 : vector<1x512xf32>
    %c1_29 = arith.constant 1 : index
    %c7_30 = arith.constant 7 : index
    %87 = memref.load %arg2[%c1_29, %c7_30] : memref<5x10xf32, #tpu.memory_space<smem>>
    %88 = vector.broadcast %87 : f32 to vector<1x512xf32>
    %89 = arith.mulf %8, %88 : vector<1x512xf32>
    %90 = arith.addf %86, %89 : vector<1x512xf32>
    %c1_31 = arith.constant 1 : index
    %c8_32 = arith.constant 8 : index
    %91 = memref.load %arg2[%c1_31, %c8_32] : memref<5x10xf32, #tpu.memory_space<smem>>
    %92 = vector.broadcast %91 : f32 to vector<1x512xf32>
    %93 = arith.mulf %9, %92 : vector<1x512xf32>
    %94 = arith.addf %90, %93 : vector<1x512xf32>
    %c1_33 = arith.constant 1 : index
    %c9_34 = arith.constant 9 : index
    %95 = memref.load %arg2[%c1_33, %c9_34] : memref<5x10xf32, #tpu.memory_space<smem>>
    %96 = vector.broadcast %95 : f32 to vector<1x512xf32>
    %97 = arith.mulf %10, %96 : vector<1x512xf32>
    %98 = arith.addf %94, %97 : vector<1x512xf32>
    %cst_35 = arith.constant 0.000000e+00 : f32
    %99 = vector.broadcast %cst_35 : f32 to vector<1x512xf32>
    %100 = arith.maximumf %98, %99 : vector<1x512xf32>
    %101 = arith.addf %56, %100 : vector<1x512xf32>
    %c2_36 = arith.constant 2 : index
    %c0_37 = arith.constant 0 : index
    %102 = memref.load %arg2[%c2_36, %c0_37] : memref<5x10xf32, #tpu.memory_space<smem>>
    %103 = vector.broadcast %102 : f32 to vector<1x512xf32>
    %104 = arith.mulf %1, %103 : vector<1x512xf32>
    %c2_38 = arith.constant 2 : index
    %105 = memref.load %arg3[%c2_38] : memref<5xf32, #tpu.memory_space<smem>>
    %106 = vector.broadcast %105 : f32 to vector<1x512xf32>
    %107 = arith.addf %104, %106 : vector<1x512xf32>
    %c2_39 = arith.constant 2 : index
    %c1_40 = arith.constant 1 : index
    %108 = memref.load %arg2[%c2_39, %c1_40] : memref<5x10xf32, #tpu.memory_space<smem>>
    %109 = vector.broadcast %108 : f32 to vector<1x512xf32>
    %110 = arith.mulf %2, %109 : vector<1x512xf32>
    %111 = arith.addf %107, %110 : vector<1x512xf32>
    %c2_41 = arith.constant 2 : index
    %c2_42 = arith.constant 2 : index
    %112 = memref.load %arg2[%c2_41, %c2_42] : memref<5x10xf32, #tpu.memory_space<smem>>
    %113 = vector.broadcast %112 : f32 to vector<1x512xf32>
    %114 = arith.mulf %3, %113 : vector<1x512xf32>
    %115 = arith.addf %111, %114 : vector<1x512xf32>
    %c2_43 = arith.constant 2 : index
    %c3_44 = arith.constant 3 : index
    %116 = memref.load %arg2[%c2_43, %c3_44] : memref<5x10xf32, #tpu.memory_space<smem>>
    %117 = vector.broadcast %116 : f32 to vector<1x512xf32>
    %118 = arith.mulf %4, %117 : vector<1x512xf32>
    %119 = arith.addf %115, %118 : vector<1x512xf32>
    %c2_45 = arith.constant 2 : index
    %c4_46 = arith.constant 4 : index
    %120 = memref.load %arg2[%c2_45, %c4_46] : memref<5x10xf32, #tpu.memory_space<smem>>
    %121 = vector.broadcast %120 : f32 to vector<1x512xf32>
    %122 = arith.mulf %5, %121 : vector<1x512xf32>
    %123 = arith.addf %119, %122 : vector<1x512xf32>
    %c2_47 = arith.constant 2 : index
    %c5_48 = arith.constant 5 : index
    %124 = memref.load %arg2[%c2_47, %c5_48] : memref<5x10xf32, #tpu.memory_space<smem>>
    %125 = vector.broadcast %124 : f32 to vector<1x512xf32>
    %126 = arith.mulf %6, %125 : vector<1x512xf32>
    %127 = arith.addf %123, %126 : vector<1x512xf32>
    %c2_49 = arith.constant 2 : index
    %c6_50 = arith.constant 6 : index
    %128 = memref.load %arg2[%c2_49, %c6_50] : memref<5x10xf32, #tpu.memory_space<smem>>
    %129 = vector.broadcast %128 : f32 to vector<1x512xf32>
    %130 = arith.mulf %7, %129 : vector<1x512xf32>
    %131 = arith.addf %127, %130 : vector<1x512xf32>
    %c2_51 = arith.constant 2 : index
    %c7_52 = arith.constant 7 : index
    %132 = memref.load %arg2[%c2_51, %c7_52] : memref<5x10xf32, #tpu.memory_space<smem>>
    %133 = vector.broadcast %132 : f32 to vector<1x512xf32>
    %134 = arith.mulf %8, %133 : vector<1x512xf32>
    %135 = arith.addf %131, %134 : vector<1x512xf32>
    %c2_53 = arith.constant 2 : index
    %c8_54 = arith.constant 8 : index
    %136 = memref.load %arg2[%c2_53, %c8_54] : memref<5x10xf32, #tpu.memory_space<smem>>
    %137 = vector.broadcast %136 : f32 to vector<1x512xf32>
    %138 = arith.mulf %9, %137 : vector<1x512xf32>
    %139 = arith.addf %135, %138 : vector<1x512xf32>
    %c2_55 = arith.constant 2 : index
    %c9_56 = arith.constant 9 : index
    %140 = memref.load %arg2[%c2_55, %c9_56] : memref<5x10xf32, #tpu.memory_space<smem>>
    %141 = vector.broadcast %140 : f32 to vector<1x512xf32>
    %142 = arith.mulf %10, %141 : vector<1x512xf32>
    %143 = arith.addf %139, %142 : vector<1x512xf32>
    %cst_57 = arith.constant 0.000000e+00 : f32
    %144 = vector.broadcast %cst_57 : f32 to vector<1x512xf32>
    %145 = arith.maximumf %143, %144 : vector<1x512xf32>
    %146 = arith.addf %101, %145 : vector<1x512xf32>
    %c3_58 = arith.constant 3 : index
    %c0_59 = arith.constant 0 : index
    %147 = memref.load %arg2[%c3_58, %c0_59] : memref<5x10xf32, #tpu.memory_space<smem>>
    %148 = vector.broadcast %147 : f32 to vector<1x512xf32>
    %149 = arith.mulf %1, %148 : vector<1x512xf32>
    %c3_60 = arith.constant 3 : index
    %150 = memref.load %arg3[%c3_60] : memref<5xf32, #tpu.memory_space<smem>>
    %151 = vector.broadcast %150 : f32 to vector<1x512xf32>
    %152 = arith.addf %149, %151 : vector<1x512xf32>
    %c3_61 = arith.constant 3 : index
    %c1_62 = arith.constant 1 : index
    %153 = memref.load %arg2[%c3_61, %c1_62] : memref<5x10xf32, #tpu.memory_space<smem>>
    %154 = vector.broadcast %153 : f32 to vector<1x512xf32>
    %155 = arith.mulf %2, %154 : vector<1x512xf32>
    %156 = arith.addf %152, %155 : vector<1x512xf32>
    %c3_63 = arith.constant 3 : index
    %c2_64 = arith.constant 2 : index
    %157 = memref.load %arg2[%c3_63, %c2_64] : memref<5x10xf32, #tpu.memory_space<smem>>
    %158 = vector.broadcast %157 : f32 to vector<1x512xf32>
    %159 = arith.mulf %3, %158 : vector<1x512xf32>
    %160 = arith.addf %156, %159 : vector<1x512xf32>
    %c3_65 = arith.constant 3 : index
    %c3_66 = arith.constant 3 : index
    %161 = memref.load %arg2[%c3_65, %c3_66] : memref<5x10xf32, #tpu.memory_space<smem>>
    %162 = vector.broadcast %161 : f32 to vector<1x512xf32>
    %163 = arith.mulf %4, %162 : vector<1x512xf32>
    %164 = arith.addf %160, %163 : vector<1x512xf32>
    %c3_67 = arith.constant 3 : index
    %c4_68 = arith.constant 4 : index
    %165 = memref.load %arg2[%c3_67, %c4_68] : memref<5x10xf32, #tpu.memory_space<smem>>
    %166 = vector.broadcast %165 : f32 to vector<1x512xf32>
    %167 = arith.mulf %5, %166 : vector<1x512xf32>
    %168 = arith.addf %164, %167 : vector<1x512xf32>
    %c3_69 = arith.constant 3 : index
    %c5_70 = arith.constant 5 : index
    %169 = memref.load %arg2[%c3_69, %c5_70] : memref<5x10xf32, #tpu.memory_space<smem>>
    %170 = vector.broadcast %169 : f32 to vector<1x512xf32>
    %171 = arith.mulf %6, %170 : vector<1x512xf32>
    %172 = arith.addf %168, %171 : vector<1x512xf32>
    %c3_71 = arith.constant 3 : index
    %c6_72 = arith.constant 6 : index
    %173 = memref.load %arg2[%c3_71, %c6_72] : memref<5x10xf32, #tpu.memory_space<smem>>
    %174 = vector.broadcast %173 : f32 to vector<1x512xf32>
    %175 = arith.mulf %7, %174 : vector<1x512xf32>
    %176 = arith.addf %172, %175 : vector<1x512xf32>
    %c3_73 = arith.constant 3 : index
    %c7_74 = arith.constant 7 : index
    %177 = memref.load %arg2[%c3_73, %c7_74] : memref<5x10xf32, #tpu.memory_space<smem>>
    %178 = vector.broadcast %177 : f32 to vector<1x512xf32>
    %179 = arith.mulf %8, %178 : vector<1x512xf32>
    %180 = arith.addf %176, %179 : vector<1x512xf32>
    %c3_75 = arith.constant 3 : index
    %c8_76 = arith.constant 8 : index
    %181 = memref.load %arg2[%c3_75, %c8_76] : memref<5x10xf32, #tpu.memory_space<smem>>
    %182 = vector.broadcast %181 : f32 to vector<1x512xf32>
    %183 = arith.mulf %9, %182 : vector<1x512xf32>
    %184 = arith.addf %180, %183 : vector<1x512xf32>
    %c3_77 = arith.constant 3 : index
    %c9_78 = arith.constant 9 : index
    %185 = memref.load %arg2[%c3_77, %c9_78] : memref<5x10xf32, #tpu.memory_space<smem>>
    %186 = vector.broadcast %185 : f32 to vector<1x512xf32>
    %187 = arith.mulf %10, %186 : vector<1x512xf32>
    %188 = arith.addf %184, %187 : vector<1x512xf32>
    %cst_79 = arith.constant 0.000000e+00 : f32
    %189 = vector.broadcast %cst_79 : f32 to vector<1x512xf32>
    %190 = arith.maximumf %188, %189 : vector<1x512xf32>
    %191 = arith.addf %146, %190 : vector<1x512xf32>
    %c4_80 = arith.constant 4 : index
    %c0_81 = arith.constant 0 : index
    %192 = memref.load %arg2[%c4_80, %c0_81] : memref<5x10xf32, #tpu.memory_space<smem>>
    %193 = vector.broadcast %192 : f32 to vector<1x512xf32>
    %194 = arith.mulf %1, %193 : vector<1x512xf32>
    %c4_82 = arith.constant 4 : index
    %195 = memref.load %arg3[%c4_82] : memref<5xf32, #tpu.memory_space<smem>>
    %196 = vector.broadcast %195 : f32 to vector<1x512xf32>
    %197 = arith.addf %194, %196 : vector<1x512xf32>
    %c4_83 = arith.constant 4 : index
    %c1_84 = arith.constant 1 : index
    %198 = memref.load %arg2[%c4_83, %c1_84] : memref<5x10xf32, #tpu.memory_space<smem>>
    %199 = vector.broadcast %198 : f32 to vector<1x512xf32>
    %200 = arith.mulf %2, %199 : vector<1x512xf32>
    %201 = arith.addf %197, %200 : vector<1x512xf32>
    %c4_85 = arith.constant 4 : index
    %c2_86 = arith.constant 2 : index
    %202 = memref.load %arg2[%c4_85, %c2_86] : memref<5x10xf32, #tpu.memory_space<smem>>
    %203 = vector.broadcast %202 : f32 to vector<1x512xf32>
    %204 = arith.mulf %3, %203 : vector<1x512xf32>
    %205 = arith.addf %201, %204 : vector<1x512xf32>
    %c4_87 = arith.constant 4 : index
    %c3_88 = arith.constant 3 : index
    %206 = memref.load %arg2[%c4_87, %c3_88] : memref<5x10xf32, #tpu.memory_space<smem>>
    %207 = vector.broadcast %206 : f32 to vector<1x512xf32>
    %208 = arith.mulf %4, %207 : vector<1x512xf32>
    %209 = arith.addf %205, %208 : vector<1x512xf32>
    %c4_89 = arith.constant 4 : index
    %c4_90 = arith.constant 4 : index
    %210 = memref.load %arg2[%c4_89, %c4_90] : memref<5x10xf32, #tpu.memory_space<smem>>
    %211 = vector.broadcast %210 : f32 to vector<1x512xf32>
    %212 = arith.mulf %5, %211 : vector<1x512xf32>
    %213 = arith.addf %209, %212 : vector<1x512xf32>
    %c4_91 = arith.constant 4 : index
    %c5_92 = arith.constant 5 : index
    %214 = memref.load %arg2[%c4_91, %c5_92] : memref<5x10xf32, #tpu.memory_space<smem>>
    %215 = vector.broadcast %214 : f32 to vector<1x512xf32>
    %216 = arith.mulf %6, %215 : vector<1x512xf32>
    %217 = arith.addf %213, %216 : vector<1x512xf32>
    %c4_93 = arith.constant 4 : index
    %c6_94 = arith.constant 6 : index
    %218 = memref.load %arg2[%c4_93, %c6_94] : memref<5x10xf32, #tpu.memory_space<smem>>
    %219 = vector.broadcast %218 : f32 to vector<1x512xf32>
    %220 = arith.mulf %7, %219 : vector<1x512xf32>
    %221 = arith.addf %217, %220 : vector<1x512xf32>
    %c4_95 = arith.constant 4 : index
    %c7_96 = arith.constant 7 : index
    %222 = memref.load %arg2[%c4_95, %c7_96] : memref<5x10xf32, #tpu.memory_space<smem>>
    %223 = vector.broadcast %222 : f32 to vector<1x512xf32>
    %224 = arith.mulf %8, %223 : vector<1x512xf32>
    %225 = arith.addf %221, %224 : vector<1x512xf32>
    %c4_97 = arith.constant 4 : index
    %c8_98 = arith.constant 8 : index
    %226 = memref.load %arg2[%c4_97, %c8_98] : memref<5x10xf32, #tpu.memory_space<smem>>
    %227 = vector.broadcast %226 : f32 to vector<1x512xf32>
    %228 = arith.mulf %9, %227 : vector<1x512xf32>
    %229 = arith.addf %225, %228 : vector<1x512xf32>
    %c4_99 = arith.constant 4 : index
    %c9_100 = arith.constant 9 : index
    %230 = memref.load %arg2[%c4_99, %c9_100] : memref<5x10xf32, #tpu.memory_space<smem>>
    %231 = vector.broadcast %230 : f32 to vector<1x512xf32>
    %232 = arith.mulf %10, %231 : vector<1x512xf32>
    %233 = arith.addf %229, %232 : vector<1x512xf32>
    %cst_101 = arith.constant 0.000000e+00 : f32
    %234 = vector.broadcast %cst_101 : f32 to vector<1x512xf32>
    %235 = arith.maximumf %233, %234 : vector<1x512xf32>
    %236 = arith.addf %191, %235 : vector<1x512xf32>
    %c0_102 = arith.constant 0 : index
    %c0_103 = arith.constant 0 : index
    %237 = vector.load %arg4[%c0_102, %c0_103] : memref<1x512xf32, #tpu.memory_space<vmem>>, vector<1x512xf32>
    tpu.vector_store %arg4[%c0_102, %c0_103], %236 {strides = array<i32>} : memref<1x512xf32, #tpu.memory_space<vmem>>, vector<1x512xf32>,
    return
  }
  func.func @transform_0(%arg0: i32) -> (i32, i32) {
    %c0_i32 = arith.constant 0 : i32
    %c0_i32_0 = arith.constant 0 : i32
    return %c0_i32, %arg0 : i32, i32
  }
  func.func @transform_1(%arg0: i32) -> (i32, i32) {
    %c0_i32 = arith.constant 0 : i32
    %c0_i32_0 = arith.constant 0 : i32
    %c0_i32_1 = arith.constant 0 : i32
    return %c0_i32, %c0_i32_0 : i32, i32
  }
  func.func @transform_2(%arg0: i32) -> i32 {
    %c0_i32 = arith.constant 0 : i32
    %c0_i32_0 = arith.constant 0 : i32
    return %c0_i32 : i32
  }
  func.func @transform_3(%arg0: i32) -> (i32, i32) {
    %c0_i32 = arith.constant 0 : i32
    %c0_i32_0 = arith.constant 0 : i32
    return %c0_i32, %arg0 : i32, i32
  }
}

</mosaic_0001>

<bundles_post_ra>
// kernel: simple_model_forward.1
= control target key start
LH: loop header
LB: loop body
LE: loop exit
PB: predicated region body
PF: predicated region fallthrough
CT: control target
= control target key end

     0   :  { %8 = vsyncpa [#allocation5], 0  ;;  %s2302_s0 = inlined_call_operand.vmem [shape: f32[10,1024], index: 0, kind: input, shape index: {}]   ;;  %s2303_s1 = inlined_call_operand.vmem [shape: f32[5,10], index: 1, kind: input, shape index: {}]   ;;  %s2304_s2 = inlined_call_operand.vmem [shape: f32[5], index: 2, kind: input, shape index: {}]   ;;  %s2305_s3 = inlined_call_operand.hbm [shape: f32[1,1024], index: 3, kind: output, shape index: {}]  }
   0x1   :  { %9 = vsyncpa [#allocation7], 0 }
   0x2   :  { %10 = vsyncpa [#allocation4], 0 }
   0x3   :  { %12 = vsyncpa [#allocation4 + $0x1], 0  ;;  %s1674_s12 = smov 0   ;;  %s1676_s13 = smov 0  }
   0x4   :  { %s1678_s14 = smov 0   ;;  %s1680_s15 = smov 0  }
   0x5 LB: > { %s1695_s16 = sadd.s32 4294967295, %s1648_s15   ;;  %s1406_s17 = sadd.s32 4294967294, %s1648_s15   ;;  %s1648_s15 = sphi %s1680_s15, %s2325_s15   ;;  %s1644_s14 = sphi %s1678_s14, %s2324_s14   ;;  %s1640_s13 = sphi %s1676_s13, %s2323_s13   ;;  %s1636_s12 = sphi %s1674_s12, %s2322_s12  }
   0x6   : > { %s1699_s18 = sadd.s32 1, %s1648_s15   ;;  %s25_s19 = sadd.s32 1, %s1644_s14 }
   0x7   : > { %s22_s20 = ssub.s32 %s1648_s15, %s1699_s18  ;;  %p32_p0 = scmp.ne.s32.totalorder %s1644_s14, %s1640_s13 }
   0x8   : > { %p23_p1 = scmp.eq.s32.totalorder %s22_s20, 0  ;;  %p33_p2 = scmp.eq.s32.totalorder %s1648_s15, 0 }
   0x9   : > { %p104_p3 = scmp.eq.s32.totalorder %s1695_s16, 1  ;;  %p109_p4 = scmp.ne.s32.totalorder %s1640_s13, %s1636_s12 }
   0xa   : > { %s1711_s21 = scalar_select %p23_p1, %s1644_s14, %s25_s19  }
   0xb   : > { %p1713_p5 = por %p33_p2, %p32_p0  ;;  %p1717_p6 = por %p104_p3, %p32_p0 }
   0xc   : > { %p110_p7 = scmp.eq.s32.totalorder %s1406_s17, 1  ;;  %p1407_p8 = scmp.ge.s32.totalorder %s1648_s15, 1 }
   0xd   : > { %s2309_s22 = scalar_select %p1713_p5, 1, 0 }
   0xe   : > { %s2310_s23 = scalar_select %p1717_p6, 1, 0 }
   0xf   : > { %p117_p9 = scmp.lt.s32.totalorder %s1648_s15, 3  ;;  %p1723_p10 = por %p110_p7, %p109_p4 }
  0x10   : > { %p2306_p11 = scmp.eq.s32.totalorder %s1695_s16, 0  ;;  %s130_s28 = sshll.u32 %s2303_s1, 4  ;;  %s131_s28 = int_to_ptr.vmem [resolvable:$true] %s130_s28 }
  0x11   : > { %s2311_s24 = scalar_select %p1723_p10, 1, 0 }
  0x12   : > { %p1728_p12 = pnand %p1407_p8, %p117_p9  ;;  %s141_s4 = sshll.u32 %s2304_s2, 4  ;;  %s142_s4 = int_to_ptr.vmem [resolvable:$true] %s141_s4 }
  0x13   : > { %s1548_s6 = scalar_lea.vmem %s131_s28, 128  ;;  %p1556_p7 = scmp.lt.s32.totalorder %s131_s28, %s131_s28 }
  0x14   : > { %s2312_s25 = scalar_select %p1728_p12, 1, 0 }
  0x15   : > { %p1489_p13 = pneg %p1728_p12  ;;  %p1549_p1 = scmp.ne.s32.totalorder %s131_s28, %s1548_s6 }
  0x16   : > { %p1557_p8 = scmp.lt.s32.totalorder %s1548_s6, %s1548_s6 }
  0x17   : > { %p1742_p0 = pnand %p2306_p11, %p1489_p13 }
  0x18   : > { %p1558_p9 = por %p1557_p8, %p1556_p7 }
  0x19   : > { %p1550_p2 = pneg %p1742_p0 }
  0x1b   : > { %p1551_p3 = pnand %p1550_p2, %p1549_p1 }
  0x1d   : > { %p1552_p4 = pneg %p1551_p3 }
  0x1f   : > { %p1559_p10 = pnand %p1558_p9, %p1552_p4 }
  0x21   : > { %1562 = shalt.err (!%p1559_p10)
}
  0x22   : > { %s1650_s7 = smov [#allocation3]   ;;  %s1563_s8 = scalar_lea.vmem %s142_s4, 16 }
  0x23   : > { %1492 = dma.vmem_to_smem (!%p1742_p0), %s131_s28, 128, %s1650_s7, [#allocation5]  }
  0x24   : > { %p1564_p13 = scmp.ne.s32.totalorder %s142_s4, %s1563_s8  ;;  %p1571_p12 = scmp.lt.s32.totalorder %s142_s4, %s142_s4 }
  0x25   : > { %p1572_p5 = scmp.lt.s32.totalorder %s1563_s8, %s1563_s8 }
  0x26   : > { %p1566_p11 = pnand %p1564_p13, %p1550_p2 }
  0x27   : > { %p1573_p1 = por %p1572_p5, %p1571_p12 }
  0x28   : > { %p1567_p6 = pneg %p1566_p11 }
  0x2a   : > { %p1574_p3 = pnand %p1573_p1, %p1567_p6 }
  0x2c   : > { %1577 = shalt.err (!%p1574_p3)
}
  0x2d   : > { %s1651_s9 = smov [#allocation6]   ;;  %p1410_p10 = scmp.ge.s32.totalorder %s1648_s15, 2 }
  0x2e   : > { %1495 = dma.vmem_to_smem (!%p1742_p0), %s142_s4, 16, %s1651_s9, [#allocation7]  }
  0x2f   : > { %148 = sbr.rel (%p1410_p10) target bundleno = 62 (0x3e), region = 24  ;;  %p2314_p4 = scmp.ne.s32.totalorder (!%p1410_p10), %s2309_s22, 0 }
  0x36   : > { %151 = sbr.rel (!%p2314_p4) target bundleno = 62 (0x3e), region = 28  ;;  %s153_s10 = sand.u32 (%p2314_p4), 1, %s1644_s14  }
  0x37   : > { %s1477_s11 = sshll.u32 (%p2314_p4), %s1648_s15, 5  ;;  %s1411_s17 = sshll.u32 (%p2314_p4), %s153_s10, 6 }
  0x38   : > { %s158_s26 = scalar_lea.vmem (%p2314_p4), %s2302_s0, %s1477_s11  ;;  %s155_s27 = scalar_lea.vmem (%p2314_p4), [#allocation2], %s1411_s17 }
  0x39   : > { %v171_v0 = vld [vmem:[%s158_s26] sm:$0xff] (%p2314_p4)  ;;  %v173_v1 = vld [vmem:[%s158_s26 + $0x8] sm:$0xff] (%p2314_p4)  ;;  %v175_v2 = vld [vmem:[%s158_s26 + $0x10] sm:$0xff] (%p2314_p4) }
  0x3a   : > { %172 = vst [vmem:[%s155_s27] sm:$0xff] (%p2314_p4), %v171_v0  ;;  %174 = vst [vmem:[%s155_s27 + $0x8] sm:$0xff] (%p2314_p4), %v173_v1  ;;  %v177_v3 = vld [vmem:[%s158_s26 + $0x18] sm:$0xff] (%p2314_p4)  ;;  %v179_v4 = vld [vmem:[%s158_s26 + $0x40] sm:$0xff] (%p2314_p4) }
  0x3b   : > { %176 = vst [vmem:[%s155_s27 + $0x10] sm:$0xff] (%p2314_p4), %v175_v2  ;;  %v181_v5 = vld [vmem:[%s158_s26 + $0x48] sm:$0xff] (%p2314_p4)  ;;  %178 = vst [vmem:[%s155_s27 + $0x18] sm:$0xff] (%p2314_p4), %v177_v3  ;;  %v183_v6 = vld [vmem:[%s158_s26 + $0x50] sm:$0xff] (%p2314_p4) }
  0x3c   : > { %180 = vst [vmem:[%s155_s27 + $0x20] sm:$0xff] (%p2314_p4), %v179_v4  ;;  %182 = vst [vmem:[%s155_s27 + $0x28] sm:$0xff] (%p2314_p4), %v181_v5  ;;  %v185_v7 = vld [vmem:[%s158_s26 + $0x58] sm:$0xff] (%p2314_p4) }
  0x3d   : > { %184 = vst [vmem:[%s155_s27 + $0x30] sm:$0xff] %v183_v6  ;;  %186 = vst [vmem:[%s155_s27 + $0x38] sm:$0xff] %v185_v7 }
  0x3e PF: > { %p2315_p5 = scmp.ne.s32.totalorder %s2312_s25, 0 }
  0x3f   : > { %s1765_s22 = sand.u32 (!%p2315_p5), 1, %s1640_s13   ;;  %p2316_p6 = scmp.eq.s32.totalorder (!%p2315_p5), %s1695_s16, 0 }
  0x40   : > { %195 = sbr.rel (%p2315_p5) target bundleno = 274 (0x112), region = 51  ;;  %s1415_s28 = sshll.u32 (!%p2315_p5), %s1765_s22, 6 }
  0x41   : > { %s1768_s29 = scalar_lea.vmem (!%p2315_p5), [#allocation2], %s1415_s28 }
  0x47   : > { %1623 = dma.done.wait (%p2316_p6), [#allocation5], 128   ;;  %p2317_p11 = pmov %p2316_p6 }
  0x48   : > { %p2318_p12 = pmov %p2316_p6 }
  0x49   : > { %1625 = vsyncadd (%p2317_p11), [#allocation5], 4294967168 }
  0x4a   : > { %1627 = dma.done.wait (%p2318_p12), [#allocation7], 16   ;;  %p2319_p0 = pmov %p2316_p6 }
  0x4c   : > { %1629 = vsyncadd (%p2319_p0), [#allocation7], 4294967280 }
  0x4d   : > { %212 = sfence }
  0x4e   : > { %s240_s25 = sld [smem:[#allocation3]]  ;;  %v1779_v8 = vld [vmem:[%s1768_s29] sm:$0xff]  ;;  %v1782_v9 = vld [vmem:[%s1768_s29 + $0x8] sm:$0xff]  ;;  %s1419_s4 = sld [smem:[#allocation3 + $0x1]]  ;;  %v1785_v10 = vld [vmem:[%s1768_s29 + $0x10] sm:$0xff] }
  0x4f   : > { %s246_s30 = sld [smem:[#allocation6]]  ;;  %s1420_s5 = sld [smem:[#allocation3 + $0x2]]  ;;  %v1788_v11 = vld [vmem:[%s1768_s29 + $0x18] sm:$0xff] }
  0x50   : > { %s1421_s6 = sld [smem:[#allocation3 + $0x3]]  ;;  %s1422_s7 = sld [smem:[#allocation3 + $0x4]] }
  0x51   : > { %s1802_s8 = sld [smem:[#allocation3 + $0x5]]  ;;  %s1804_s9 = sld [smem:[#allocation3 + $0x6]] }
  0x52   : > { %s1806_s10 = sld [smem:[#allocation3 + $0x7]]  ;;  %s1808_s11 = sld [smem:[#allocation3 + $0x8]] }
  0x53   : > { %s1826_s17 = sld [smem:[#allocation3 + $0x9]]  ;;  %s1832_s19 = sld [smem:[#allocation3 + $0x80]] }
  0x54   : > { %v241_v12 = vstv %s240_s25  ;;  %v253_v22 = vstv %s1419_s4  ;;  %s1834_s20 = sld [smem:[#allocation6 + $0x1]]  ;;  %s1862_s27 = sld [smem:[#allocation3 + $0x82]] }
  0x55   : > { %v242_v13 = vmul.f32 %v241_v12, %v1779_v8  ;;  %v243_v14 = vmul.f32 %v241_v12, %v1782_v9  ;;  %v244_v15 = vmul.f32 %v241_v12, %v1785_v10  ;;  %v245_v16 = vmul.f32 %v241_v12, %v1788_v11  ;;  %s1836_s26 = sld [smem:[#allocation3 + $0x81]]  ;;  %s1864_s28 = sld [smem:[#allocation3 + $0x83]] }
  0x56   : > { %v247_v17 = vstv %s246_s30  ;;  %v275_v23 = vstv %s1420_s5  ;;  %v297_v24 = vstv %s1421_s6  ;;  %v319_v25 = vstv %s1422_s7  ;;  %s1433_s25 = sld [smem:[#allocation3 + $0x84]]  ;;  %s1434_s30 = sld [smem:[#allocation3 + $0x85]] }
  0x57   : > { %v248_v18 = vadd.f32 %v247_v17, %v242_v13  ;;  %v249_v19 = vadd.f32 %v247_v17, %v243_v14  ;;  %v250_v20 = vadd.f32 %v247_v17, %v244_v15  ;;  %v251_v21 = vadd.f32 %v247_v17, %v245_v16  ;;  %s1896_s4 = sld [smem:[#allocation3 + $0x86]]  ;;  %s1898_s5 = sld [smem:[#allocation3 + $0x87]] }
  0x58   : > { %v254_v26 = vmul.f32 %v253_v22, %v1779_v8  ;;  %v255_v27 = vmul.f32 %v253_v22, %v1782_v9  ;;  %v256_v28 = vmul.f32 %v253_v22, %v1785_v10  ;;  %v257_v29 = vmul.f32 %v253_v22, %v1788_v11  ;;  %s1900_s6 = sld [smem:[#allocation3 + $0x88]]  ;;  %s1902_s7 = sld [smem:[#allocation3 + $0x89]] }
  0x59   : > { %v276_v30 = vmul.f32 %v275_v23, %v1779_v8  ;;  %v277_v31 = vmul.f32 %v275_v23, %v1782_v9  ;;  %v278_v32 = vmul.f32 %v275_v23, %v1785_v10  ;;  %v279_v33 = vmul.f32 %v275_v23, %v1788_v11  ;;  %p2320_p7 = scmp.ne.s32.totalorder %s2310_s23, 0 }
  0x5a   : > { %v262_v34 = vrot.slane %v254_v26, 1  ;;  %v263_v35 = vrot.slane %v255_v27, 1  ;;  %v264_v36 = vrot.slane %v256_v28, 1  ;;  %v265_v37 = vrot.slane %v257_v29, 1 }
  0x5b   : > { %v284_v38 = vrot.slane %v276_v30, 2  ;;  %v285_v39 = vrot.slane %v277_v31, 2  ;;  %v286_v40 = vrot.slane %v278_v32, 2  ;;  %v287_v41 = vrot.slane %v279_v33, 2 }
  0x5c   : > { %v270_v42 = vadd.f32 %v262_v34, %v248_v18  ;;  %v271_v43 = vadd.f32 %v263_v35, %v249_v19  ;;  %v272_v44 = vadd.f32 %v264_v36, %v250_v20  ;;  %v273_v45 = vadd.f32 %v265_v37, %v251_v21  ;;  %v1839_v34 = vld [vmem:[%s1768_s29 + $0x20] sm:$0x3] }
  0x5d   : > { %v298_v46 = vmul.f32 %v297_v24, %v1779_v8  ;;  %v299_v47 = vmul.f32 %v297_v24, %v1782_v9  ;;  %v300_v48 = vmul.f32 %v297_v24, %v1785_v10  ;;  %v301_v49 = vmul.f32 %v297_v24, %v1788_v11 }
  0x5e   : > { %v292_v50 = vadd.f32 %v284_v38, %v270_v42  ;;  %v293_v51 = vadd.f32 %v285_v39, %v271_v43  ;;  %v294_v52 = vadd.f32 %v286_v40, %v272_v44  ;;  %v295_v53 = vadd.f32 %v287_v41, %v273_v45  ;;  %v1842_v39 = vld [vmem:[%s1768_s29 + $0x28] sm:$0x3]  ;;  %v1845_v40 = vld [vmem:[%s1768_s29 + $0x30] sm:$0x3]  ;;  %v1848_v41 = vld [vmem:[%s1768_s29 + $0x38] sm:$0x3] }
  0x5f   : > { %v306_v54 = vrot.slane %v298_v46, 3  ;;  %v307_v55 = vrot.slane %v299_v47, 3  ;;  %v308_v56 = vrot.slane %v300_v48, 3  ;;  %v309_v57 = vrot.slane %v301_v49, 3 }
  0x60   : > { %v320_v58 = vmul.f32 %v319_v25, %v1779_v8  ;;  %v321_v59 = vmul.f32 %v319_v25, %v1782_v9  ;;  %v322_v60 = vmul.f32 %v319_v25, %v1785_v10  ;;  %v323_v61 = vmul.f32 %v319_v25, %v1788_v11 }
  0x61   : > { %v314_v62 = vadd.f32 %v306_v54, %v292_v50  ;;  %v315_v63 = vadd.f32 %v307_v55, %v293_v51  ;;  %v316_v0 = vadd.f32 %v308_v56, %v294_v52  ;;  %v317_v1 = vadd.f32 %v309_v57, %v295_v53 }
  0x62   : > { %v328_v2 = vrot.slane %v320_v58, 4  ;;  %v329_v3 = vrot.slane %v321_v59, 4  ;;  %v330_v4 = vrot.slane %v322_v60, 4  ;;  %v331_v5 = vrot.slane %v323_v61, 4 }
  0x63   : > { %v341_v6 = vstv %s1802_s8  ;;  %v363_v7 = vstv %s1804_s9  ;;  %v385_v12 = vstv %s1806_s10  ;;  %v407_v13 = vstv %s1808_s11  ;;  %s1924_s8 = sld [smem:[#allocation3 + $0x100]]  ;;  %s1926_s9 = sld [smem:[#allocation6 + $0x2]] }
  0x64   : > { %v336_v14 = vadd.f32 %v328_v2, %v314_v62  ;;  %v337_v15 = vadd.f32 %v329_v3, %v315_v63  ;;  %v338_v16 = vadd.f32 %v330_v4, %v316_v0  ;;  %v339_v17 = vadd.f32 %v331_v5, %v317_v1  ;;  %s1932_s10 = sld [smem:[#allocation3 + $0x101]]  ;;  %s1934_s11 = sld [smem:[#allocation3 + $0x102]] }
  0x65   : > { %v342_v18 = vmul.f32 %v341_v6, %v1779_v8  ;;  %v343_v19 = vmul.f32 %v341_v6, %v1782_v9  ;;  %v344_v20 = vmul.f32 %v341_v6, %v1785_v10  ;;  %v345_v21 = vmul.f32 %v341_v6, %v1788_v11 }
  0x66   : > { %v364_v22 = vmul.f32 %v363_v7, %v1779_v8  ;;  %v365_v23 = vmul.f32 %v363_v7, %v1782_v9  ;;  %v366_v24 = vmul.f32 %v363_v7, %v1785_v10  ;;  %v367_v25 = vmul.f32 %v363_v7, %v1788_v11 }
  0x67   : > { %v350_v26 = vrot.slane %v342_v18, 5  ;;  %v351_v27 = vrot.slane %v343_v19, 5  ;;  %v352_v28 = vrot.slane %v344_v20, 5  ;;  %v353_v29 = vrot.slane %v345_v21, 5 }
  0x68   : > { %v372_v30 = vrot.slane %v364_v22, 6  ;;  %v373_v31 = vrot.slane %v365_v23, 6  ;;  %v374_v32 = vrot.slane %v366_v24, 6  ;;  %v375_v33 = vrot.slane %v367_v25, 6 }
  0x69   : > { %v358_v35 = vadd.f32 %v350_v26, %v336_v14  ;;  %v359_v36 = vadd.f32 %v351_v27, %v337_v15  ;;  %v360_v37 = vadd.f32 %v352_v28, %v338_v16  ;;  %v361_v38 = vadd.f32 %v353_v29, %v339_v17 }
  0x6a   : > { %v386_v42 = vmul.f32 %v385_v12, %v1779_v8  ;;  %v387_v43 = vmul.f32 %v385_v12, %v1782_v9  ;;  %v388_v44 = vmul.f32 %v385_v12, %v1785_v10  ;;  %v389_v45 = vmul.f32 %v385_v12, %v1788_v11 }
  0x6b   : > { %v380_v46 = vadd.f32 %v372_v30, %v358_v35  ;;  %v381_v47 = vadd.f32 %v373_v31, %v359_v36  ;;  %v382_v48 = vadd.f32 %v374_v32, %v360_v37  ;;  %v383_v49 = vadd.f32 %v375_v33, %v361_v38 }
  0x6c   : > { %v394_v50 = vrot.slane %v386_v42, 7  ;;  %v395_v51 = vrot.slane %v387_v43, 7  ;;  %v396_v52 = vrot.slane %v388_v44, 7  ;;  %v397_v53 = vrot.slane %v389_v45, 7 }
  0x6d   : > { %v408_v54 = vmul.f32 %v407_v13, %v1839_v34  ;;  %v409_v55 = vmul.f32 %v407_v13, %v1842_v39  ;;  %v410_v56 = vmul.f32 %v407_v13, %v1845_v40  ;;  %v411_v57 = vmul.f32 %v407_v13, %v1848_v41 }
  0x6e   : > { %v402_v58 = vadd.f32 %v394_v50, %v380_v46  ;;  %v403_v59 = vadd.f32 %v395_v51, %v381_v47  ;;  %v404_v60 = vadd.f32 %v396_v52, %v382_v48  ;;  %v405_v61 = vadd.f32 %v397_v53, %v383_v49 }
  0x6f   : > { %v417_v62 = vstv %s1826_s17  ;;  %v447_v63 = vstv %s1832_s19  ;;  %v453_v0 = vstv %s1834_s20  ;;  %v459_v1 = vstv %s1836_s26  ;;  %s1956_s17 = sld [smem:[#allocation3 + $0x103]]  ;;  %s1958_s19 = sld [smem:[#allocation3 + $0x104]] }
  0x70   : > { %v412_v2 = vadd.f32 %v408_v54, %v402_v58  ;;  %v413_v3 = vadd.f32 %v409_v55, %v403_v59  ;;  %v414_v4 = vadd.f32 %v410_v56, %v404_v60  ;;  %v415_v5 = vadd.f32 %v411_v57, %v405_v61  ;;  %s1964_s20 = sld [smem:[#allocation3 + $0x105]]  ;;  %s1966_s26 = sld [smem:[#allocation3 + $0x106]] }
  0x71   : > { %v418_v6 = vmul.f32 %v417_v62, %v1839_v34  ;;  %v419_v7 = vmul.f32 %v417_v62, %v1842_v39  ;;  %v420_v12 = vmul.f32 %v417_v62, %v1845_v40  ;;  %v421_v13 = vmul.f32 %v417_v62, %v1848_v41 }
  0x72   : > { %v448_v14 = vmul.f32 %v447_v63, %v1779_v8  ;;  %v449_v15 = vmul.f32 %v447_v63, %v1782_v9  ;;  %v450_v16 = vmul.f32 %v447_v63, %v1785_v10  ;;  %v451_v17 = vmul.f32 %v447_v63, %v1788_v11 }
  0x73   : > { %v426_v18 = vrot.slane %v418_v6, 1  ;;  %v427_v19 = vrot.slane %v419_v7, 1  ;;  %v428_v20 = vrot.slane %v420_v12, 1  ;;  %v429_v21 = vrot.slane %v421_v13, 1 }
  0x74   : > { %v454_v22 = vadd.f32 %v453_v0, %v448_v14  ;;  %v455_v23 = vadd.f32 %v453_v0, %v449_v15  ;;  %v456_v24 = vadd.f32 %v453_v0, %v450_v16  ;;  %v457_v25 = vadd.f32 %v453_v0, %v451_v17 }
  0x75   : > { %v460_v26 = vmul.f32 %v459_v1, %v1779_v8  ;;  %v461_v27 = vmul.f32 %v459_v1, %v1782_v9  ;;  %v462_v28 = vmul.f32 %v459_v1, %v1785_v10  ;;  %v463_v29 = vmul.f32 %v459_v1, %v1788_v11 }
  0x76   : > { %v1878_v30 = vadd.f32 %v426_v18, %v412_v2  ;;  %v1880_v31 = vadd.f32 %v427_v19, %v413_v3  ;;  %v1882_v32 = vadd.f32 %v428_v20, %v414_v4  ;;  %v1884_v33 = vadd.f32 %v429_v21, %v415_v5 }
  0x77   : > { %v468_v35 = vrot.slane %v460_v26, 1  ;;  %v469_v36 = vrot.slane %v461_v27, 1  ;;  %v470_v37 = vrot.slane %v462_v28, 1  ;;  %v471_v38 = vrot.slane %v463_v29, 1 }
  0x78   : > { %v481_v42 = vstv %s1862_s27  ;;  %v503_v43 = vstv %s1864_s28  ;;  %v525_v44 = vstv %s1433_s25  ;;  %v547_v45 = vstv %s1434_s30  ;;  %s1992_s27 = sld [smem:[#allocation3 + $0x107]]  ;;  %s1994_s28 = sld [smem:[#allocation3 + $0x108]] }
  0x79   : > { %v476_v46 = vadd.f32 %v468_v35, %v454_v22  ;;  %v477_v47 = vadd.f32 %v469_v36, %v455_v23  ;;  %v478_v48 = vadd.f32 %v470_v37, %v456_v24  ;;  %v479_v49 = vadd.f32 %v471_v38, %v457_v25  ;;  %s1996_s25 = sld [smem:[#allocation3 + $0x109]]  ;;  %s1998_s30 = sld [smem:[#allocation3 + $0x180]] }
  0x7a   : > { %v482_v50 = vmul.f32 %v481_v42, %v1779_v8  ;;  %v483_v51 = vmul.f32 %v481_v42, %v1782_v9  ;;  %v484_v52 = vmul.f32 %v481_v42, %v1785_v10  ;;  %v485_v53 = vmul.f32 %v481_v42, %v1788_v11 }
  0x7b   : > { %v504_v54 = vmul.f32 %v503_v43, %v1779_v8  ;;  %v505_v55 = vmul.f32 %v503_v43, %v1782_v9  ;;  %v506_v56 = vmul.f32 %v503_v43, %v1785_v10  ;;  %v507_v57 = vmul.f32 %v503_v43, %v1788_v11 }
  0x7c   : > { %v490_v58 = vrot.slane %v482_v50, 2  ;;  %v491_v59 = vrot.slane %v483_v51, 2  ;;  %v492_v60 = vrot.slane %v484_v52, 2  ;;  %v493_v61 = vrot.slane %v485_v53, 2 }
  0x7d   : > { %v512_v62 = vrot.slane %v504_v54, 3  ;;  %v513_v63 = vrot.slane %v505_v55, 3  ;;  %v514_v0 = vrot.slane %v506_v56, 3  ;;  %v515_v1 = vrot.slane %v507_v57, 3 }
  0x7e   : > { %v498_v2 = vadd.f32 %v490_v58, %v476_v46  ;;  %v499_v3 = vadd.f32 %v491_v59, %v477_v47  ;;  %v500_v4 = vadd.f32 %v492_v60, %v478_v48  ;;  %v501_v5 = vadd.f32 %v493_v61, %v479_v49 }
  0x7f   : > { %v526_v6 = vmul.f32 %v525_v44, %v1779_v8  ;;  %v527_v7 = vmul.f32 %v525_v44, %v1782_v9  ;;  %v528_v12 = vmul.f32 %v525_v44, %v1785_v10  ;;  %v529_v13 = vmul.f32 %v525_v44, %v1788_v11 }
  0x80   : > { %v520_v14 = vadd.f32 %v512_v62, %v498_v2  ;;  %v521_v15 = vadd.f32 %v513_v63, %v499_v3  ;;  %v522_v16 = vadd.f32 %v514_v0, %v500_v4  ;;  %v523_v17 = vadd.f32 %v515_v1, %v501_v5 }
  0x81   : > { %v534_v18 = vrot.slane %v526_v6, 4  ;;  %v535_v19 = vrot.slane %v527_v7, 4  ;;  %v536_v20 = vrot.slane %v528_v12, 4  ;;  %v537_v21 = vrot.slane %v529_v13, 4 }
  0x82   : > { %v548_v22 = vmul.f32 %v547_v45, %v1779_v8  ;;  %v549_v23 = vmul.f32 %v547_v45, %v1782_v9  ;;  %v550_v24 = vmul.f32 %v547_v45, %v1785_v10  ;;  %v551_v25 = vmul.f32 %v547_v45, %v1788_v11 }
  0x83   : > { %v542_v26 = vadd.f32 %v534_v18, %v520_v14  ;;  %v543_v27 = vadd.f32 %v535_v19, %v521_v15  ;;  %v544_v28 = vadd.f32 %v536_v20, %v522_v16  ;;  %v545_v29 = vadd.f32 %v537_v21, %v523_v17 }
  0x84   : > { %v556_v35 = vrot.slane %v548_v22, 5  ;;  %v557_v36 = vrot.slane %v549_v23, 5  ;;  %v558_v37 = vrot.slane %v550_v24, 5  ;;  %v559_v38 = vrot.slane %v551_v25, 5 }
  0x85   : > { %v569_v42 = vstv %s1896_s4  ;;  %v591_v43 = vstv %s1898_s5  ;;  %v613_v44 = vstv %s1900_s6  ;;  %v623_v46 = vstv %s1902_s7  ;;  %s2016_s4 = sld [smem:[#allocation6 + $0x3]]  ;;  %s2022_s5 = sld [smem:[#allocation3 + $0x181]] }
  0x86   : > { %v564_v47 = vadd.f32 %v556_v35, %v542_v26  ;;  %v565_v48 = vadd.f32 %v557_v36, %v543_v27  ;;  %v566_v49 = vadd.f32 %v558_v37, %v544_v28  ;;  %v567_v50 = vadd.f32 %v559_v38, %v545_v29  ;;  %s2024_s6 = sld [smem:[#allocation3 + $0x182]]  ;;  %s2026_s7 = sld [smem:[#allocation3 + $0x183]] }
  0x87   : > { %v570_v51 = vmul.f32 %v569_v42, %v1779_v8  ;;  %v571_v45 = vmul.f32 %v569_v42, %v1782_v9  ;;  %v572_v52 = vmul.f32 %v569_v42, %v1785_v10  ;;  %v573_v53 = vmul.f32 %v569_v42, %v1788_v11 }
  0x88   : > { %v592_v54 = vmul.f32 %v591_v43, %v1779_v8  ;;  %v593_v55 = vmul.f32 %v591_v43, %v1782_v9  ;;  %v594_v56 = vmul.f32 %v591_v43, %v1785_v10  ;;  %v595_v57 = vmul.f32 %v591_v43, %v1788_v11 }
  0x89   : > { %v578_v58 = vrot.slane %v570_v51, 6  ;;  %v579_v59 = vrot.slane %v571_v45, 6  ;;  %v580_v60 = vrot.slane %v572_v52, 6  ;;  %v581_v61 = vrot.slane %v573_v53, 6 }
  0x8a   : > { %v600_v62 = vrot.slane %v592_v54, 7  ;;  %v601_v63 = vrot.slane %v593_v55, 7  ;;  %v602_v0 = vrot.slane %v594_v56, 7  ;;  %v603_v1 = vrot.slane %v595_v57, 7 }
  0x8b   : > { %v586_v2 = vadd.f32 %v578_v58, %v564_v47  ;;  %v587_v3 = vadd.f32 %v579_v59, %v565_v48  ;;  %v588_v4 = vadd.f32 %v580_v60, %v566_v49  ;;  %v589_v5 = vadd.f32 %v581_v61, %v567_v50 }
  0x8c   : > { %v614_v6 = vmul.f32 %v613_v44, %v1839_v34  ;;  %v615_v7 = vmul.f32 %v613_v44, %v1842_v39  ;;  %v616_v12 = vmul.f32 %v613_v44, %v1845_v40  ;;  %v617_v13 = vmul.f32 %v613_v44, %v1848_v41 }
  0x8d   : > { %v608_v14 = vadd.f32 %v600_v62, %v586_v2  ;;  %v609_v15 = vadd.f32 %v601_v63, %v587_v3  ;;  %v610_v16 = vadd.f32 %v602_v0, %v588_v4  ;;  %v611_v17 = vadd.f32 %v603_v1, %v589_v5 }
  0x8e   : > { %v624_v18 = vmul.f32 %v623_v46, %v1839_v34  ;;  %v625_v19 = vmul.f32 %v623_v46, %v1842_v39  ;;  %v626_v20 = vmul.f32 %v623_v46, %v1845_v40  ;;  %v627_v21 = vmul.f32 %v623_v46, %v1848_v41 }
  0x8f   : > { %v618_v22 = vadd.f32 %v614_v6, %v608_v14  ;;  %v619_v23 = vadd.f32 %v615_v7, %v609_v15  ;;  %v620_v24 = vadd.f32 %v616_v12, %v610_v16  ;;  %v621_v25 = vadd.f32 %v617_v13, %v611_v17 }
  0x90   : > { %v632_v26 = vrot.slane %v624_v18, 1  ;;  %v633_v27 = vrot.slane %v625_v19, 1  ;;  %v634_v28 = vrot.slane %v626_v20, 1  ;;  %v635_v29 = vrot.slane %v627_v21, 1 }
  0x91   : > { %v438_v35 = vmax.f32 %v1878_v30, 0.0  ;;  %v439_v36 = vmax.f32 %v1880_v31, 0.0  ;;  %v653_v37 = vstv %s1924_s8  ;;  %v659_v38 = vstv %s1926_s9  ;;  %s2076_s8 = sld [smem:[#allocation3 + $0x184]]  ;;  %s2078_s9 = sld [smem:[#allocation3 + $0x185]] }
  0x92   : > { %v1944_v42 = vadd.f32 %v632_v26, %v618_v22  ;;  %v1946_v43 = vadd.f32 %v633_v27, %v619_v23  ;;  %v1948_v44 = vadd.f32 %v634_v28, %v620_v24  ;;  %v1950_v46 = vadd.f32 %v635_v29, %v621_v25 }
  0x93   : > { %v654_v47 = vmul.f32 %v653_v37, %v1779_v8  ;;  %v655_v48 = vmul.f32 %v653_v37, %v1782_v9  ;;  %v656_v49 = vmul.f32 %v653_v37, %v1785_v10  ;;  %v657_v50 = vmul.f32 %v653_v37, %v1788_v11 }
  0x94   : > { %v440_v51 = vmax.f32 %v1882_v32, 0.0  ;;  %v441_v45 = vmax.f32 %v1884_v33, 0.0  ;;  %v665_v52 = vstv %s1932_s10  ;;  %v687_v53 = vstv %s1934_s11  ;;  %s2084_s10 = sld [smem:[#allocation3 + $0x186]]  ;;  %s2086_s11 = sld [smem:[#allocation3 + $0x187]] }
  0x95   : > { %v644_v54 = vmax.f32 %v1944_v42, 0.0  ;;  %v645_v55 = vmax.f32 %v1946_v43, 0.0  ;;  %v646_v56 = vmax.f32 %v1948_v44, 0.0  ;;  %v647_v57 = vmax.f32 %v1950_v46, 0.0 }
  0x96   : > { %v660_v58 = vadd.f32 %v659_v38, %v654_v47  ;;  %v661_v59 = vadd.f32 %v659_v38, %v655_v48  ;;  %v662_v60 = vadd.f32 %v659_v38, %v656_v49  ;;  %v663_v61 = vadd.f32 %v659_v38, %v657_v50 }
  0x97   : > { %v666_v62 = vmul.f32 %v665_v52, %v1779_v8  ;;  %v667_v63 = vmul.f32 %v665_v52, %v1782_v9  ;;  %v668_v0 = vmul.f32 %v665_v52, %v1785_v10  ;;  %v669_v1 = vmul.f32 %v665_v52, %v1788_v11 }
  0x98   : > { %v688_v2 = vmul.f32 %v687_v53, %v1779_v8  ;;  %v689_v3 = vmul.f32 %v687_v53, %v1782_v9  ;;  %v690_v4 = vmul.f32 %v687_v53, %v1785_v10  ;;  %v691_v5 = vmul.f32 %v687_v53, %v1788_v11 }
  0x99   : > { %v674_v6 = vrot.slane %v666_v62, 1  ;;  %v675_v7 = vrot.slane %v667_v63, 1  ;;  %v676_v12 = vrot.slane %v668_v0, 1  ;;  %v677_v13 = vrot.slane %v669_v1, 1 }
  0x9a   : > { %v696_v14 = vrot.slane %v688_v2, 2  ;;  %v697_v15 = vrot.slane %v689_v3, 2  ;;  %v698_v16 = vrot.slane %v690_v4, 2  ;;  %v699_v17 = vrot.slane %v691_v5, 2 }
  0x9b   : > { %v682_v18 = vadd.f32 %v674_v6, %v660_v58  ;;  %v683_v19 = vadd.f32 %v675_v7, %v661_v59  ;;  %v684_v20 = vadd.f32 %v676_v12, %v662_v60  ;;  %v685_v21 = vadd.f32 %v677_v13, %v663_v61 }
  0x9c   : > { %v709_v22 = vstv %s1956_s17  ;;  %v731_v23 = vstv %s1958_s19  ;;  %v753_v24 = vstv %s1964_s20  ;;  %v775_v25 = vstv %s1966_s26  ;;  %s2108_s17 = sld [smem:[#allocation3 + $0x188]]  ;;  %s2110_s19 = sld [smem:[#allocation3 + $0x189]] }
  0x9d   : > { %v704_v26 = vadd.f32 %v696_v14, %v682_v18  ;;  %v705_v27 = vadd.f32 %v697_v15, %v683_v19  ;;  %v706_v28 = vadd.f32 %v698_v16, %v684_v20  ;;  %v707_v29 = vadd.f32 %v699_v17, %v685_v21  ;;  %s2112_s20 = sld [smem:[#allocation3 + $0x200]]  ;;  %s2114_s26 = sld [smem:[#allocation6 + $0x4]] }
  0x9e   : > { %v710_v37 = vmul.f32 %v709_v22, %v1779_v8  ;;  %v711_v38 = vmul.f32 %v709_v22, %v1782_v9  ;;  %v712_v47 = vmul.f32 %v709_v22, %v1785_v10  ;;  %v713_v48 = vmul.f32 %v709_v22, %v1788_v11 }
  0x9f   : > { %v732_v49 = vmul.f32 %v731_v23, %v1779_v8  ;;  %v733_v50 = vmul.f32 %v731_v23, %v1782_v9  ;;  %v734_v52 = vmul.f32 %v731_v23, %v1785_v10  ;;  %v735_v53 = vmul.f32 %v731_v23, %v1788_v11 }
  0xa0   : > { %v718_v58 = vrot.slane %v710_v37, 3  ;;  %v719_v59 = vrot.slane %v711_v38, 3  ;;  %v720_v60 = vrot.slane %v712_v47, 3  ;;  %v721_v61 = vrot.slane %v713_v48, 3 }
  0xa1   : > { %v740_v62 = vrot.slane %v732_v49, 4  ;;  %v741_v63 = vrot.slane %v733_v50, 4  ;;  %v742_v0 = vrot.slane %v734_v52, 4  ;;  %v743_v1 = vrot.slane %v735_v53, 4 }
  0xa2   : > { %v726_v2 = vadd.f32 %v718_v58, %v704_v26  ;;  %v727_v3 = vadd.f32 %v719_v59, %v705_v27  ;;  %v728_v4 = vadd.f32 %v720_v60, %v706_v28  ;;  %v729_v5 = vadd.f32 %v721_v61, %v707_v29 }
  0xa3   : > { %v754_v6 = vmul.f32 %v753_v24, %v1779_v8  ;;  %v755_v7 = vmul.f32 %v753_v24, %v1782_v9  ;;  %v756_v12 = vmul.f32 %v753_v24, %v1785_v10  ;;  %v757_v13 = vmul.f32 %v753_v24, %v1788_v11 }
  0xa4   : > { %v748_v14 = vadd.f32 %v740_v62, %v726_v2  ;;  %v749_v15 = vadd.f32 %v741_v63, %v727_v3  ;;  %v750_v16 = vadd.f32 %v742_v0, %v728_v4  ;;  %v751_v17 = vadd.f32 %v743_v1, %v729_v5 }
  0xa5   : > { %v762_v18 = vrot.slane %v754_v6, 5  ;;  %v763_v19 = vrot.slane %v755_v7, 5  ;;  %v764_v20 = vrot.slane %v756_v12, 5  ;;  %v765_v21 = vrot.slane %v757_v13, 5 }
  0xa6   : > { %v776_v22 = vmul.f32 %v775_v25, %v1779_v8  ;;  %v777_v23 = vmul.f32 %v775_v25, %v1782_v9  ;;  %v778_v26 = vmul.f32 %v775_v25, %v1785_v10  ;;  %v779_v24 = vmul.f32 %v775_v25, %v1788_v11 }
  0xa7   : > { %v770_v27 = vadd.f32 %v762_v18, %v748_v14  ;;  %v771_v28 = vadd.f32 %v763_v19, %v749_v15  ;;  %v772_v29 = vadd.f32 %v764_v20, %v750_v16  ;;  %v773_v37 = vadd.f32 %v765_v21, %v751_v17 }
  0xa8   : > { %v784_v38 = vrot.slane %v776_v22, 6  ;;  %v785_v47 = vrot.slane %v777_v23, 6  ;;  %v786_v48 = vrot.slane %v778_v26, 6  ;;  %v787_v49 = vrot.slane %v779_v24, 6 }
  0xa9   : > { %v797_v50 = vstv %s1992_s27  ;;  %v819_v52 = vstv %s1994_s28  ;;  %v829_v53 = vstv %s1996_s25  ;;  %v859_v58 = vstv %s1998_s30  ;;  %s2144_s27 = sld [smem:[#allocation3 + $0x201]]  ;;  %s2146_s28 = sld [smem:[#allocation3 + $0x202]] }
  0xaa   : > { %v792_v59 = vadd.f32 %v784_v38, %v770_v27  ;;  %v793_v60 = vadd.f32 %v785_v47, %v771_v28  ;;  %v794_v61 = vadd.f32 %v786_v48, %v772_v29  ;;  %v795_v62 = vadd.f32 %v787_v49, %v773_v37  ;;  %s2152_s25 = sld [smem:[#allocation3 + $0x203]]  ;;  %s2154_s30 = sld [smem:[#allocation3 + $0x204]] }
  0xab   : > { %v798_v63 = vmul.f32 %v797_v50, %v1779_v8  ;;  %v799_v25 = vmul.f32 %v797_v50, %v1782_v9  ;;  %v800_v0 = vmul.f32 %v797_v50, %v1785_v10  ;;  %v801_v1 = vmul.f32 %v797_v50, %v1788_v11 }
  0xac   : > { %v820_v2 = vmul.f32 %v819_v52, %v1839_v34  ;;  %v821_v3 = vmul.f32 %v819_v52, %v1842_v39  ;;  %v822_v4 = vmul.f32 %v819_v52, %v1845_v40  ;;  %v823_v5 = vmul.f32 %v819_v52, %v1848_v41 }
  0xad   : > { %v806_v6 = vrot.slane %v798_v63, 7  ;;  %v807_v7 = vrot.slane %v799_v25, 7  ;;  %v808_v12 = vrot.slane %v800_v0, 7  ;;  %v809_v13 = vrot.slane %v801_v1, 7 }
  0xae   : > { %v830_v14 = vmul.f32 %v829_v53, %v1839_v34  ;;  %v831_v15 = vmul.f32 %v829_v53, %v1842_v39  ;;  %v832_v16 = vmul.f32 %v829_v53, %v1845_v40  ;;  %v833_v17 = vmul.f32 %v829_v53, %v1848_v41 }
  0xaf   : > { %v814_v18 = vadd.f32 %v806_v6, %v792_v59  ;;  %v815_v19 = vadd.f32 %v807_v7, %v793_v60  ;;  %v816_v20 = vadd.f32 %v808_v12, %v794_v61  ;;  %v817_v21 = vadd.f32 %v809_v13, %v795_v62 }
  0xb0   : > { %v838_v22 = vrot.slane %v830_v14, 1  ;;  %v839_v23 = vrot.slane %v831_v15, 1  ;;  %v840_v26 = vrot.slane %v832_v16, 1  ;;  %v841_v24 = vrot.slane %v833_v17, 1 }
  0xb1   : > { %v824_v27 = vadd.f32 %v820_v2, %v814_v18  ;;  %v825_v28 = vadd.f32 %v821_v3, %v815_v19  ;;  %v826_v29 = vadd.f32 %v822_v4, %v816_v20  ;;  %v827_v37 = vadd.f32 %v823_v5, %v817_v21 }
  0xb2   : > { %v860_v38 = vmul.f32 %v859_v58, %v1779_v8  ;;  %v861_v47 = vmul.f32 %v859_v58, %v1782_v9  ;;  %v862_v48 = vmul.f32 %v859_v58, %v1785_v10  ;;  %v863_v49 = vmul.f32 %v859_v58, %v1788_v11 }
  0xb3   : > { %v2036_v50 = vadd.f32 %v838_v22, %v824_v27  ;;  %v2038_v52 = vadd.f32 %v839_v23, %v825_v28  ;;  %v2040_v53 = vadd.f32 %v840_v26, %v826_v29  ;;  %v2042_v59 = vadd.f32 %v841_v24, %v827_v37 }
  0xb4   : > { %v2048_v60 = vadd.f32 %v644_v54, %v438_v35  ;;  %v2054_v61 = vadd.f32 %v645_v55, %v439_v36  ;;  %v2060_v58 = vadd.f32 %v646_v56, %v440_v51  ;;  %v865_v62 = vstv %s2016_s4  ;;  %s2203_s4 = sld [smem:[#allocation3 + $0x205]] }
  0xb5   : > { %v2067_v30 = vadd.f32 %v647_v57, %v441_v45  ;;  %v871_v35 = vstv %s2022_s5  ;;  %v893_v42 = vstv %s2024_s6  ;;  %v915_v31 = vstv %s2026_s7  ;;  %s2205_s5 = sld [smem:[#allocation3 + $0x206]]  ;;  %s2207_s6 = sld [smem:[#allocation3 + $0x207]] }
  0xb6   : > { %v850_v43 = vmax.f32 %v2036_v50, 0.0  ;;  %v851_v36 = vmax.f32 %v2038_v52, 0.0  ;;  %v852_v32 = vmax.f32 %v2040_v53, 0.0  ;;  %v853_v44 = vmax.f32 %v2042_v59, 0.0  ;;  %s2209_s7 = sld [smem:[#allocation3 + $0x208]] }
  0xb7   : > { %v866_v51 = vadd.f32 %v865_v62, %v860_v38  ;;  %v867_v54 = vadd.f32 %v865_v62, %v861_v47  ;;  %v868_v55 = vadd.f32 %v865_v62, %v862_v48  ;;  %v869_v56 = vadd.f32 %v865_v62, %v863_v49 }
  0xb8   : > { %v872_v33 = vmul.f32 %v871_v35, %v1779_v8  ;;  %v873_v46 = vmul.f32 %v871_v35, %v1782_v9  ;;  %v874_v45 = vmul.f32 %v871_v35, %v1785_v10  ;;  %v875_v57 = vmul.f32 %v871_v35, %v1788_v11 }
  0xb9   : > { %v894_v63 = vmul.f32 %v893_v42, %v1779_v8  ;;  %v895_v25 = vmul.f32 %v893_v42, %v1782_v9  ;;  %v896_v0 = vmul.f32 %v893_v42, %v1785_v10  ;;  %v897_v1 = vmul.f32 %v893_v42, %v1788_v11 }
  0xba   : > { %v880_v2 = vrot.slane %v872_v33, 1  ;;  %v881_v3 = vrot.slane %v873_v46, 1  ;;  %v882_v4 = vrot.slane %v874_v45, 1  ;;  %v883_v5 = vrot.slane %v875_v57, 1 }
  0xbb   : > { %v902_v6 = vrot.slane %v894_v63, 2  ;;  %v903_v7 = vrot.slane %v895_v25, 2  ;;  %v904_v12 = vrot.slane %v896_v0, 2  ;;  %v905_v13 = vrot.slane %v897_v1, 2 }
  0xbc   : > { %v888_v14 = vadd.f32 %v880_v2, %v866_v51  ;;  %v889_v15 = vadd.f32 %v881_v3, %v867_v54  ;;  %v890_v16 = vadd.f32 %v882_v4, %v868_v55  ;;  %v891_v17 = vadd.f32 %v883_v5, %v869_v56 }
  0xbd   : > { %v916_v18 = vmul.f32 %v915_v31, %v1779_v8  ;;  %v917_v19 = vmul.f32 %v915_v31, %v1782_v9  ;;  %v918_v20 = vmul.f32 %v915_v31, %v1785_v10  ;;  %v919_v21 = vmul.f32 %v915_v31, %v1788_v11 }
  0xbe   : > { %v910_v22 = vadd.f32 %v902_v6, %v888_v14  ;;  %v911_v23 = vadd.f32 %v903_v7, %v889_v15  ;;  %v912_v26 = vadd.f32 %v904_v12, %v890_v16  ;;  %v913_v24 = vadd.f32 %v905_v13, %v891_v17 }
  0xbf   : > { %v924_v27 = vrot.slane %v916_v18, 3  ;;  %v925_v28 = vrot.slane %v917_v19, 3  ;;  %v926_v29 = vrot.slane %v918_v20, 3  ;;  %v927_v37 = vrot.slane %v919_v21, 3 }
  0xc0   : > { %v937_v38 = vstv %s2076_s8  ;;  %v959_v47 = vstv %s2078_s9  ;;  %v981_v48 = vstv %s2084_s10  ;;  %v1003_v49 = vstv %s2086_s11  ;;  %s2231_s8 = sld [smem:[#allocation3 + $0x209]]  ;;  %s1478_s9 = sshll.u32 %s1695_s16, 6 }
  0xc1   : > { %v932_v62 = vadd.f32 %v924_v27, %v910_v22  ;;  %v933_v35 = vadd.f32 %v925_v28, %v911_v23  ;;  %v934_v42 = vadd.f32 %v926_v29, %v912_v26  ;;  %v935_v51 = vadd.f32 %v927_v37, %v913_v24  ;;  %v2121_v27 = vld [vmem:[%s1768_s29] sm:$0xff]  ;;  %v2133_v29 = vld [vmem:[%s1768_s29 + $0x18] sm:$0xff]  ;;  %s1653_s16 = smov [#allocation8]  }
  0xc2   : > { %v938_v54 = vmul.f32 %v937_v38, %v1779_v8  ;;  %v939_v31 = vmul.f32 %v937_v38, %v1782_v9  ;;  %v940_v55 = vmul.f32 %v937_v38, %v1785_v10  ;;  %v941_v56 = vmul.f32 %v937_v38, %v1788_v11 }
  0xc3   : > { %v960_v33 = vmul.f32 %v959_v47, %v1779_v8  ;;  %v961_v46 = vmul.f32 %v959_v47, %v1782_v9  ;;  %v962_v45 = vmul.f32 %v959_v47, %v1785_v10  ;;  %v963_v57 = vmul.f32 %v959_v47, %v1788_v11 }
  0xc4   : > { %v946_v63 = vrot.slane %v938_v54, 4  ;;  %v947_v25 = vrot.slane %v939_v31, 4  ;;  %v948_v0 = vrot.slane %v940_v55, 4  ;;  %v949_v1 = vrot.slane %v941_v56, 4 }
  0xc5   : > { %v968_v2 = vrot.slane %v960_v33, 5  ;;  %v969_v3 = vrot.slane %v961_v46, 5  ;;  %v970_v4 = vrot.slane %v962_v45, 5  ;;  %v971_v5 = vrot.slane %v963_v57, 5 }
  0xc6   : > { %v954_v6 = vadd.f32 %v946_v63, %v932_v62  ;;  %v955_v7 = vadd.f32 %v947_v25, %v933_v35  ;;  %v956_v12 = vadd.f32 %v948_v0, %v934_v42  ;;  %v957_v13 = vadd.f32 %v949_v1, %v935_v51 }
  0xc7   : > { %v982_v14 = vmul.f32 %v981_v48, %v1779_v8  ;;  %v983_v15 = vmul.f32 %v981_v48, %v1782_v9  ;;  %v984_v16 = vmul.f32 %v981_v48, %v1785_v10  ;;  %v985_v17 = vmul.f32 %v981_v48, %v1788_v11  ;;  %v2125_v9 = vld [vmem:[%s1768_s29 + $0x8] sm:$0xff]  ;;  %v2129_v11 = vld [vmem:[%s1768_s29 + $0x10] sm:$0xff] }
  0xc8   : > { %v976_v18 = vadd.f32 %v968_v2, %v954_v6  ;;  %v977_v19 = vadd.f32 %v969_v3, %v955_v7  ;;  %v978_v20 = vadd.f32 %v970_v4, %v956_v12  ;;  %v979_v21 = vadd.f32 %v971_v5, %v957_v13 }
  0xc9   : > { %v990_v22 = vrot.slane %v982_v14, 6  ;;  %v991_v23 = vrot.slane %v983_v15, 6  ;;  %v992_v26 = vrot.slane %v984_v16, 6  ;;  %v993_v24 = vrot.slane %v985_v17, 6 }
  0xca   : > { %v1004_v8 = vmul.f32 %v2121_v27, %v1003_v49  ;;  %v1005_v10 = vmul.f32 %v2125_v9, %v1003_v49  ;;  %v1006_v28 = vmul.f32 %v2129_v11, %v1003_v49  ;;  %v1007_v37 = vmul.f32 %v2133_v29, %v1003_v49 }
  0xcb   : > { %v998_v38 = vadd.f32 %v990_v22, %v976_v18  ;;  %v999_v47 = vadd.f32 %v991_v23, %v977_v19  ;;  %v1000_v48 = vadd.f32 %v992_v26, %v978_v20  ;;  %v1001_v62 = vadd.f32 %v993_v24, %v979_v21 }
  0xcc   : > { %v1012_v35 = vrot.slane %v1004_v8, 7  ;;  %v1013_v42 = vrot.slane %v1005_v10, 7  ;;  %v1014_v51 = vrot.slane %v1006_v28, 7  ;;  %v1015_v54 = vrot.slane %v1007_v37, 7 }
  0xcd   : > { %v1025_v31 = vstv %s2108_s17  ;;  %v1035_v55 = vstv %s2110_s19  ;;  %v1065_v56 = vstv %s2112_s20  ;;  %v1071_v33 = vstv %s2114_s26  ;;  %s2258_s20 = scalar_lea.hbm %s2305_s3, %s1478_s9  ;;  %s1305_s26 = scalar_lea.sflag [#allocation4], %s1765_s22 }
  0xce   : > { %v1020_v46 = vadd.f32 %v1012_v35, %v998_v38  ;;  %v1021_v45 = vadd.f32 %v1013_v42, %v999_v47  ;;  %v1022_v57 = vadd.f32 %v1014_v51, %v1000_v48  ;;  %v1023_v63 = vadd.f32 %v1015_v54, %v1001_v62 }
  0xcf   : > { %v1026_v25 = vmul.f32 %v1025_v31, %v1839_v34  ;;  %v1027_v49 = vmul.f32 %v1025_v31, %v1842_v39  ;;  %v1028_v0 = vmul.f32 %v1025_v31, %v1845_v40  ;;  %v1029_v1 = vmul.f32 %v1025_v31, %v1848_v41 }
  0xd0   : > { %v1036_v2 = vmul.f32 %v1035_v55, %v1839_v34  ;;  %v1037_v3 = vmul.f32 %v1035_v55, %v1842_v39  ;;  %v1038_v4 = vmul.f32 %v1035_v55, %v1845_v40  ;;  %v1039_v5 = vmul.f32 %v1035_v55, %v1848_v41 }
  0xd1   : > { %v1030_v6 = vadd.f32 %v1026_v25, %v1020_v46  ;;  %v1031_v7 = vadd.f32 %v1027_v49, %v1021_v45  ;;  %v1032_v12 = vadd.f32 %v1028_v0, %v1022_v57  ;;  %v1033_v13 = vadd.f32 %v1029_v1, %v1023_v63 }
  0xd2   : > { %v1044_v14 = vrot.slane %v1036_v2, 1  ;;  %v1045_v15 = vrot.slane %v1037_v3, 1  ;;  %v1046_v16 = vrot.slane %v1038_v4, 1  ;;  %v1047_v17 = vrot.slane %v1039_v5, 1 }
  0xd3   : > { %v1066_v34 = vmul.f32 %v2121_v27, %v1065_v56  ;;  %v1067_v39 = vmul.f32 %v2125_v9, %v1065_v56  ;;  %v1068_v40 = vmul.f32 %v2129_v11, %v1065_v56  ;;  %v1069_v41 = vmul.f32 %v2133_v29, %v1065_v56 }
  0xd4   : > { %v2160_v18 = vadd.f32 %v1044_v14, %v1030_v6  ;;  %v2162_v19 = vadd.f32 %v1045_v15, %v1031_v7  ;;  %v2164_v20 = vadd.f32 %v1046_v16, %v1032_v12  ;;  %v2169_v21 = vadd.f32 %v850_v43, %v2048_v60 }
  0xd5   : > { %v2174_v22 = vadd.f32 %v851_v36, %v2054_v61  ;;  %v2179_v23 = vadd.f32 %v852_v32, %v2060_v58  ;;  %v2184_v26 = vadd.f32 %v853_v44, %v2067_v30  ;;  %v2186_v24 = vadd.f32 %v1047_v17, %v1033_v13 }
  0xd6   : > { %v1072_v50 = vadd.f32 %v1071_v33, %v1066_v34  ;;  %v1073_v60 = vadd.f32 %v1071_v33, %v1067_v39  ;;  %v1074_v43 = vadd.f32 %v1071_v33, %v1068_v40  ;;  %v1056_v8 = vmax.f32 %v2160_v18, 0.0 }
  0xd7   : > { %v1075_v52 = vadd.f32 %v1071_v33, %v1069_v41  ;;  %v1077_v61 = vstv %s2144_s27  ;;  %v1099_v36 = vstv %s2146_s28  ;;  %v1057_v10 = vmax.f32 %v2162_v19, 0.0  ;;  %s1582_s28 = sshll.u32 %s1653_s16, 4  ;;  %s1583_s28 = int_to_ptr.vmem [resolvable:$false] %s1582_s28 }
  0xd8   : > { %v1058_v53 = vmax.f32 %v2164_v20, 0.0  ;;  %v1121_v58 = vstv %s2152_s25  ;;  %v1143_v32 = vstv %s2154_s30  ;;  %v1078_v59 = vmul.f32 %v2121_v27, %v1077_v61  ;;  %s1584_s25 = scalar_lea.vmem %s1583_s28, 128 }
  0xd9   : > { %v1079_v30 = vmul.f32 %v2125_v9, %v1077_v61  ;;  %v1080_v44 = vmul.f32 %v2129_v11, %v1077_v61  ;;  %v1081_v28 = vmul.f32 %v2133_v29, %v1077_v61  ;;  %v1100_v37 = vmul.f32 %v2121_v27, %v1099_v36 }
  0xda   : > { %v1101_v38 = vmul.f32 %v2125_v9, %v1099_v36  ;;  %v1102_v47 = vmul.f32 %v2129_v11, %v1099_v36  ;;  %v1103_v48 = vmul.f32 %v2133_v29, %v1099_v36  ;;  %v1086_v62 = vrot.slane %v1078_v59, 1 }
  0xdb   : > { %v1087_v35 = vrot.slane %v1079_v30, 1  ;;  %v1088_v42 = vrot.slane %v1080_v44, 1  ;;  %v1089_v51 = vrot.slane %v1081_v28, 1  ;;  %v1108_v54 = vrot.slane %v1100_v37, 2 }
  0xdc   : > { %v1109_v31 = vrot.slane %v1101_v38, 2  ;;  %v1110_v55 = vrot.slane %v1102_v47, 2  ;;  %v1111_v56 = vrot.slane %v1103_v48, 2  ;;  %v1094_v33 = vadd.f32 %v1086_v62, %v1072_v50 }
  0xdd   : > { %v1095_v46 = vadd.f32 %v1087_v35, %v1073_v60  ;;  %v1096_v45 = vadd.f32 %v1088_v42, %v1074_v43  ;;  %v1097_v57 = vadd.f32 %v1089_v51, %v1075_v52  ;;  %v1122_v63 = vmul.f32 %v2121_v27, %v1121_v58 }
  0xde   : > { %v1123_v25 = vmul.f32 %v2125_v9, %v1121_v58  ;;  %v1124_v49 = vmul.f32 %v2129_v11, %v1121_v58  ;;  %v1125_v0 = vmul.f32 %v2133_v29, %v1121_v58  ;;  %v1116_v1 = vadd.f32 %v1108_v54, %v1094_v33 }
  0xdf   : > { %v1117_v2 = vadd.f32 %v1109_v31, %v1095_v46  ;;  %v1118_v3 = vadd.f32 %v1110_v55, %v1096_v45  ;;  %v1119_v4 = vadd.f32 %v1111_v56, %v1097_v57  ;;  %v1130_v5 = vrot.slane %v1122_v63, 3 }
  0xe0   : > { %v1131_v6 = vrot.slane %v1123_v25, 3  ;;  %v1132_v7 = vrot.slane %v1124_v49, 3  ;;  %v1133_v12 = vrot.slane %v1125_v0, 3  ;;  %v1144_v13 = vmul.f32 %v2121_v27, %v1143_v32 }
  0xe1   : > { %v1145_v14 = vmul.f32 %v2125_v9, %v1143_v32  ;;  %v1146_v15 = vmul.f32 %v2129_v11, %v1143_v32  ;;  %v1147_v16 = vmul.f32 %v2133_v29, %v1143_v32  ;;  %v1138_v17 = vadd.f32 %v1130_v5, %v1116_v1 }
  0xe2   : > { %v1139_v34 = vadd.f32 %v1131_v6, %v1117_v2  ;;  %v1140_v39 = vadd.f32 %v1132_v7, %v1118_v3  ;;  %v1141_v40 = vadd.f32 %v1133_v12, %v1119_v4  ;;  %v1152_v41 = vrot.slane %v1144_v13, 4 }
  0xe3   : > { %v1153_v50 = vrot.slane %v1145_v14, 4  ;;  %v1154_v60 = vrot.slane %v1146_v15, 4  ;;  %v1155_v43 = vrot.slane %v1147_v16, 4  ;;  %v1165_v52 = vstv %s2203_s4  ;;  %v1544_v16 = vld [vmem:[%s1768_s29 + $0x20] sm:$0x3] }
  0xe4   : > { %v1187_v61 = vstv %s2205_s5  ;;  %v1209_v36 = vstv %s2207_s6  ;;  %v1231_v58 = vstv %s2209_s7  ;;  %v1160_v59 = vadd.f32 %v1152_v41, %v1138_v17 }
  0xe5   : > { %v1161_v30 = vadd.f32 %v1153_v50, %v1139_v34  ;;  %v1162_v44 = vadd.f32 %v1154_v60, %v1140_v39  ;;  %v1163_v28 = vadd.f32 %v1155_v43, %v1141_v40  ;;  %v1166_v37 = vmul.f32 %v2121_v27, %v1165_v52  ;;  %v1546_v39 = vld [vmem:[%s1768_s29 + $0x30] sm:$0x3]  ;;  %v1547_v40 = vld [vmem:[%s1768_s29 + $0x38] sm:$0x3] }
  0xe6   : > { %v1167_v32 = vmul.f32 %v2125_v9, %v1165_v52  ;;  %v1168_v38 = vmul.f32 %v2129_v11, %v1165_v52  ;;  %v1169_v47 = vmul.f32 %v2133_v29, %v1165_v52  ;;  %v1188_v48 = vmul.f32 %v2121_v27, %v1187_v61 }
  0xe7   : > { %v1189_v62 = vmul.f32 %v2125_v9, %v1187_v61  ;;  %v1190_v35 = vmul.f32 %v2129_v11, %v1187_v61  ;;  %v1191_v42 = vmul.f32 %v2133_v29, %v1187_v61  ;;  %v1174_v51 = vrot.slane %v1166_v37, 5 }
  0xe8   : > { %v1175_v54 = vrot.slane %v1167_v32, 5  ;;  %v1176_v31 = vrot.slane %v1168_v38, 5  ;;  %v1177_v55 = vrot.slane %v1169_v47, 5  ;;  %v1196_v56 = vrot.slane %v1188_v48, 6 }
  0xe9   : > { %v1197_v33 = vrot.slane %v1189_v62, 6  ;;  %v1198_v46 = vrot.slane %v1190_v35, 6  ;;  %v1199_v45 = vrot.slane %v1191_v42, 6  ;;  %v1182_v57 = vadd.f32 %v1174_v51, %v1160_v59 }
  0xea   : > { %v1183_v63 = vadd.f32 %v1175_v54, %v1161_v30  ;;  %v1184_v25 = vadd.f32 %v1176_v31, %v1162_v44  ;;  %v1185_v49 = vadd.f32 %v1177_v55, %v1163_v28  ;;  %v1210_v0 = vmul.f32 %v2121_v27, %v1209_v36  ;;  %v1545_v27 = vld [vmem:[%s1768_s29 + $0x28] sm:$0x3]  ;;  %s1418_s29 = sshll.u32 %s1765_s22, 2 }
  0xeb   : > { %v1211_v1 = vmul.f32 %v2125_v9, %v1209_v36  ;;  %v1212_v2 = vmul.f32 %v2129_v11, %v1209_v36  ;;  %v1213_v3 = vmul.f32 %v2133_v29, %v1209_v36  ;;  %v1204_v4 = vadd.f32 %v1196_v56, %v1182_v57  ;;  %s229_s10 = scalar_lea.vmem [#allocation8], %s1418_s29 }
  0xec   : > { %v1205_v5 = vadd.f32 %v1197_v33, %v1183_v63  ;;  %v1206_v6 = vadd.f32 %v1198_v46, %v1184_v25  ;;  %v1207_v7 = vadd.f32 %v1199_v45, %v1185_v49  ;;  %v1218_v12 = vrot.slane %v1210_v0, 7  ;;  %s1319_s11 = sshll.u32 %s229_s10, 4  ;;  %s2260_s11 = int_to_ptr.vmem [resolvable:$true] %s1319_s11 }
  0xed   : > { %v1219_v13 = vrot.slane %v1211_v1, 7  ;;  %v1220_v14 = vrot.slane %v1212_v2, 7  ;;  %v1221_v15 = vrot.slane %v1213_v3, 7  ;;  %v1232_v17 = vmul.f32 %v1544_v16, %v1231_v58  ;;  %s1578_s27 = scalar_lea.vmem %s2260_s11, 64  ;;  %p1585_p13 = scmp.lt.s32.totalorder %s2260_s11, %s1583_s28 }
  0xee   : > { %v1233_v34 = vmul.f32 %v1545_v27, %v1231_v58  ;;  %v1234_v9 = vmul.f32 %v1546_v39, %v1231_v58  ;;  %v1235_v11 = vmul.f32 %v1547_v40, %v1231_v58  ;;  %v1226_v41 = vadd.f32 %v1218_v12, %v1204_v4  ;;  %p1579_p2 = scmp.ne.s32.totalorder %s2260_s11, %s1578_s27  ;;  %p1586_p1 = scmp.lt.s32.totalorder %s1584_s25, %s1578_s27 }
  0xef   : > { %v1227_v50 = vadd.f32 %v1219_v13, %v1205_v5  ;;  %v1228_v29 = vadd.f32 %v1220_v14, %v1206_v6  ;;  %v1229_v60 = vadd.f32 %v1221_v15, %v1207_v7  ;;  %v1059_v43 = vmax.f32 %v2186_v24, 0.0 }
  0xf0   : > { %v1241_v52 = vstv %s2231_s8  ;;  %v1279_v61 = vlaneseq  ;;  %v1236_v36 = vadd.f32 %v1232_v17, %v1226_v41  ;;  %v1060_v58 = vadd.f32 %v1056_v8, %v2169_v21  ;;  %p1580_p8 = pnand %p1579_p2, %p2320_p7  ;;  %p1587_p3 = por %p1586_p1, %p1585_p13 }
  0xf1   : > { %v1237_v59 = vadd.f32 %v1233_v34, %v1227_v50  ;;  %v1238_v30 = vadd.f32 %v1234_v9, %v1228_v29  ;;  %v1239_v44 = vadd.f32 %v1235_v11, %v1229_v60  ;;  %v1242_v28 = vmul.f32 %v1544_v16, %v1241_v52 }
  0xf2   : > { %v1243_v37 = vmul.f32 %v1545_v27, %v1241_v52  ;;  %v1244_v32 = vmul.f32 %v1546_v39, %v1241_v52  ;;  %v1245_v38 = vmul.f32 %v1547_v40, %v1241_v52  ;;  %v1061_v47 = vadd.f32 %v1057_v10, %v2174_v22  ;;  %p1581_p9 = pneg %p1580_p8 }
  0xf3   : > { %v1652_v48 = vmov 1966171168   ;;  %v1250_v62 = vrot.slane %v1242_v28, 1  ;;  %v1062_v54 = vadd.f32 %v1058_v53, %v2179_v23  ;;  %v1063_v31 = vadd.f32 %v1059_v43, %v2184_v26 }
  0xf4   : > { %v1277_v24 = vunpack.c.l.s4 %v1652_v48  ;;  %v1251_v35 = vrot.slane %v1243_v37, 1  ;;  %v1252_v42 = vrot.slane %v1244_v32, 1  ;;  %v1253_v51 = vrot.slane %v1245_v38, 1  ;;  %p1588_p4 = pnand %p1587_p3, %p1581_p9 }
  0xf5   : > { %v1280_v18 = vshrl.u32 %v1279_v61, 7  ;;  %v1258_v21 = vadd.f32 %v1250_v62, %v1236_v36  ;;  %vm1301_vm0 = vcmp.lt.s32.totalorder %v1279_v61, 512 }
  0xf6   : > { %v1278_v55 = vunpack.c.0.s8 %v1277_v24  ;;  %v1259_v8 = vadd.f32 %v1251_v35, %v1237_v59  ;;  %v1260_v56 = vadd.f32 %v1252_v42, %v1238_v30  ;;  %v1261_v19 = vadd.f32 %v1253_v51, %v1239_v44 }
  0xf7   : > { %v1262_v22 = vmax.f32 %v1258_v21, 0.0 }
  0xf8   : > { %v1263_v10 = vmax.f32 %v1259_v8, 0.0  ;;  %v1264_v33 = vmax.f32 %v1260_v56, 0.0  ;;  %v1265_v46 = vmax.f32 %v1261_v19, 0.0  ;;  %v1281_v45 = vsub.s32 %v1278_v55, %v1280_v18 }
  0xf9   : > { %v1266_v57 = vadd.f32 %v1262_v22, %v1060_v58 }
  0xfa   : > { %v1267_v63 = vadd.f32 %v1263_v10, %v1061_v47  ;;  %v1268_v20 = vadd.f32 %v1264_v33, %v1062_v54  ;;  %v1269_v23 = vadd.f32 %v1265_v46, %v1063_v31 }
  0xfc   : > { %v1274_v53 = vcombine.low %v1266_v57, %v1267_v63  ;;  %v1275_v26 = vcombine.low %v1268_v20, %v1269_v23 }
  0xfe   : > { %v1282_v25 = vrot.slane %v1274_v53, %v1281_v45  ;;  %v1289_v49 = vrot.slane %v1275_v26, %v1281_v45 }
 0x100   : > { %v1290_v0 = vcombine.low %v1282_v25, %v1289_v49 }
 0x102   : > { %v1297_v1 = vrot.slane %v1290_v0, %v1281_v45 }
 0x104   : > { %1303 = vst.msk [vmem:[%s229_s10] sm:$0xf] %vm1301_vm0, %v1297_v1 }
 0x105   : > { %1591 = shalt.err (!%p1588_p4)
}
 0x106   : > { %s1592_s22 = scalar_lea.hbm %s2258_s20, 64  ;;  %s1596_s5 = scalar_lea.hbm %s2305_s3, 128 }
 0x107   : > { %p1593_p5 = scmp.ne.s32.totalorder %s2258_s20, %s1592_s22  ;;  %p1597_p12 = scmp.lt.u32.totalorder %s2258_s20, %s2305_s3 }
 0x108   : > { %p1598_p0 = scmp.lt.u32.totalorder %s1596_s5, %s1592_s22  ;;  %p1600_p8 = scmp.lt.u32.totalorder %s1592_s22, %s2258_s20 }
 0x109   : > { %p1594_p6 = pnand %p1593_p5, %p2320_p7 }
 0x10a   : > { %p1599_p2 = por %p1598_p0, %p1597_p12 }
 0x10b   : > { %p1595_p11 = pneg %p1594_p6 }
 0x10c   : > { %p1601_p9 = por %p1600_p8, %p1599_p2 }
 0x10e   : > { %p1602_p13 = pnand %p1601_p9, %p1595_p11 }
 0x110   : > { %1605 = shalt.err (!%p1602_p13)
}
 0x111   : > { %1487 = dma.vmem_to_hbm [thread:$0]  (%p2320_p7), %s2260_s11, 64, %s2258_s20, %s1305_s26  }
 0x112 PF: > { %s1331_s8 = sand.u32 1, %s1636_s12   ;;  %p2321_p1 = scmp.ne.s32.totalorder %s2311_s24, 0 }
 0x113   : > { %s1332_s29 = scalar_lea.sflag [#allocation4], %s1331_s8 }
 0x114   : > { %p1497_p3 = pnand %p1410_p10, %p2321_p1 }
 0x116   : > { %1631 = dma.done.wait (!%p1497_p3), %s1332_s29, 64  }
 0x117   : > { %1633 = vsyncadd (!%p1497_p3), %s1332_s29, 4294967232  ;;  %p15_p4 = scmp.ge.s32.totalorder %s1699_s18, 4   ;;  %s2322_s12 = smov %s1640_s13 }
 0x118   : > { %s2323_s13 = smov %s1644_s14  ;;  %s2324_s14 = smov %s1711_s21 }
 0x119   : > { %s2325_s15 = smov %s1699_s18  ;;  %17 = sbr.rel (!%p15_p4) target bundleno = 5 (0x5), region = 104 }
 0x120   :  { %1337 = vsyncpa [#allocation4], 1 }
 0x121   :  { %1339 = vsyncpa [#allocation4 + $0x1], 1 }
 0x122   :  { %1340 = vsyncpa [#allocation5], 1 }
 0x123   :  { %1342 = vsyncpa [#allocation5 + $0x1], 1 }
 0x124   :  { %1343 = vsyncpa [#allocation7], 1 }

</bundles_post_ra>
